<compile_context>
chip_gen: v7x
topology: tpu7x:2x2x1
jax: 0.10.0
libtpu: 0.0.40
codegen_flags: <defaults>
</compile_context>

<pallas_src>
import jax
import jax.numpy as jnp
from jax import lax
from jax.experimental import pallas as pl
from jax.experimental.pallas import tpu as pltpu

_EPS = 1e-5


# ------------------------------- Pallas kernel ------------------------------ #
def _decoder_block_kernel(x_ref, xh_ref, w1_ref, b1_ref, w2_ref, b2_ref,
                          w3_ref, b3_ref, o_ref):
    """Fused DecoderBlock on one (batch, row-block) tile.

    x_ref  : (TR, W, Cin)  input rows of one image
    xh_ref : (1,  W, Cin)  halo row (first row of the next row block)
    w*_ref : BN-scale-folded weights ; b*_ref : folded per-channel shifts
    o_ref  : (4, TR*W, nf) phase-planar output, phase index = 2*p + q for
             output row parity p and column parity q
    """
    tr, w, cin = x_ref.shape
    mid = w1_ref.shape[1]
    nf = w3_ref.shape[1]
    m = tr * w

    w1 = w1_ref[...]
    b1 = b1_ref[...]

    # ---- stage 1: 1x1 conv (+folded BN) + ReLU on block rows and halo row ----
    y1 = jnp.dot(x_ref[...].reshape(m, cin), w1,
                 preferred_element_type=jnp.float32)
    y1 = jnp.maximum(y1 + b1, 0.0).reshape(tr, w, mid)

    yh = jnp.dot(xh_ref[...].reshape(w, cin), w1,
                 preferred_element_type=jnp.float32)
    yh = jnp.maximum(yh + b1, 0.0)
    # the halo row does not exist below the last image row -> zero contribution
    is_last = pl.program_id(1) == pl.num_programs(1) - 1
    yh = (yh * jnp.where(is_last, 0.0, 1.0)).reshape(1, w, mid)

    # ---- neighbours needed by the sub-pixel phases (zero outside the image) --
    a = y1                                                   # pixel (iy,   ix)
    ad = jnp.concatenate([y1[1:], yh], axis=0)               # pixel (iy+1, ix)
    zcol = jnp.zeros((tr, 1, mid), jnp.float32)
    ar = jnp.concatenate([a[:, 1:, :], zcol], axis=1)        # pixel (iy,   ix+1)
    adr = jnp.concatenate([ad[:, 1:, :], zcol], axis=1)      # pixel (iy+1, ix+1)

    af = a.reshape(m, mid)
    adf = ad.reshape(m, mid)
    arf = ar.reshape(m, mid)
    adrf = adr.reshape(m, mid)

    # ---- stage 2: ConvTranspose2d(3, stride=2, pad=1, out_pad=1) + BN + ReLU
    # out[2a+p, 2b+q] = sum over the taps listed below; w2_ref[ky*3+kx] is the
    # (cin, cout) matrix of tap (ky, kx), already scaled by the BN scale.
    b2 = b2_ref[...]

    def phase(*terms):
        acc = b2
        for xx, k in terms:
            acc = acc + jnp.dot(xx, w2_ref[k],
                                preferred_element_type=jnp.float32)
        return jnp.maximum(acc, 0.0)

    ee = phase((af, 4))                                      # (p, q) = (0, 0)
    eo = phase((af, 5), (arf, 3))                            # (0, 1)
    oe = phase((af, 7), (adf, 1))                            # (1, 0)
    oo = phase((af, 8), (arf, 6), (adf, 2), (adrf, 0))       # (1, 1)

    # ---- stage 3: 1x1 conv (+folded BN) + ReLU over all four phases at once --
    y3 = jnp.dot(jnp.concatenate([ee, eo, oe, oo], axis=0), w3_ref[...],
                 preferred_element_type=jnp.float32)
    y3 = jnp.maximum(y3 + b3_ref[...], 0.0)                  # (4*m, nf)
    o_ref[...] = y3.reshape(4, m, nf).astype(o_ref.dtype)


# ------------------------------ wrapper / tiling ---------------------------- #
def _pick_row_block(h, w, cin, nf, budget_bytes=1 << 19):
    """Largest row block that still gives >=2 row blocks and fits the budget."""
    bytes_per_row = w * max(cin, 4 * nf) * 4
    cands = [tr for tr in range(2, h // 2 + 1)
             if h % tr == 0 and (tr * w) % 8 == 0
             and tr * bytes_per_row <= budget_bytes]
    return max(cands) if cands else h


def _fold_params(p):
    """Fold inference-mode BatchNorm (+ conv bias) into weights and shifts."""
    def fold(gamma, beta, mean, var):
        s = gamma / jnp.sqrt(var + _EPS)
        return s, beta - mean * s

    s1, t1 = fold(*p["bn1"])
    s2, t2 = fold(*p["bn2"])
    s3, t3 = fold(*p["bn3"])
    mid = p["w2_t"].shape[0]

    w1 = jnp.transpose(p["w1_t"][:, :, 0, 0]) * s1[None, :]           # (cin, mid)
    b1 = (p["b1"] * s1 + t1).reshape(1, mid)
    # taps: [ky*3+kx] -> (cin, cout), BN scale folded over cout
    w2 = (jnp.transpose(p["w2_t"], (2, 3, 0, 1)).reshape(9, mid, mid)
          * s2[None, None, :])
    b2 = (p["b2"] * s2 + t2).reshape(1, mid)
    w3 = jnp.transpose(p["w3_t"][:, :, 0, 0]) * s3[None, :]           # (mid, nf)
    b3 = (p["b3"] * s3 + t3).reshape(1, -1)
    return w1, b1, w2, b2, w3, b3


def decoder_block(x_nchw, params):
    n, cin, h, w = x_nchw.shape
    w1, b1, w2, b2, w3, b3 = _fold_params(params)
    mid = w1.shape[1]
    nf = w3.shape[1]

    x = jnp.transpose(x_nchw, (0, 2, 3, 1))                 # NCHW -> NHWC
    xpad = jnp.pad(x, ((0, 0), (0, 1), (0, 0), (0, 0)))     # +1 zero halo row

    tr = _pick_row_block(h, w, cin, nf)
    grid = (n, h // tr)

    out = pl.pallas_call(
        _decoder_block_kernel,
        out_shape=jax.ShapeDtypeStruct((n, 4, h * w, nf), x.dtype),
        grid=grid,
        in_specs=[
            pl.BlockSpec((None, tr, w, cin), lambda b, r: (b, r, 0, 0)),
            pl.BlockSpec((None, 1, w, cin), lambda b, r: (b, r * tr + tr, 0, 0)),
            pl.BlockSpec((cin, mid), lambda b, r: (0, 0)),
            pl.BlockSpec((1, mid), lambda b, r: (0, 0)),
            pl.BlockSpec((9, mid, mid), lambda b, r: (0, 0, 0)),
            pl.BlockSpec((1, mid), lambda b, r: (0, 0)),
            pl.BlockSpec((mid, nf), lambda b, r: (0, 0)),
            pl.BlockSpec((1, nf), lambda b, r: (0, 0)),
        ],
        out_specs=pl.BlockSpec((None, 4, tr * w, nf), lambda b, r: (b, 0, r, 0)),
        compiler_params=pltpu.CompilerParams(
            dimension_semantics=("parallel", "parallel")),
    )(xpad, xpad, w1, b1, w2, b2, w3, b3)

    # Phase untangling folded into the NHWC->NCHW transpose we need anyway:
    # out[n, 2p+q, a*W+b, c] == y[n, c, 2a+p, 2b+q]
    out = out.reshape(n, 2, 2, h, w, nf)
    out = jnp.transpose(out, (0, 5, 3, 1, 4, 2))            # (n, c, a, p, b, q)
    return out.reshape(n, nf, 2 * h, 2 * w)


# ------------------------- deterministic parameters ------------------------- #
def make_params(key, in_channels, n_filters):
    mid = in_channels // 4
    ks = jax.random.split(key, 18)

    def bn(kg, kb, km, kv, c):
        gamma = jax.random.uniform(kg, (c,), jnp.float32, 0.5, 1.5)
        beta = 0.1 * jax.random.normal(kb, (c,), jnp.float32)
        mean = 0.1 * jax.random.normal(km, (c,), jnp.float32)
        var = jax.random.uniform(kv, (c,), jnp.float32, 0.5, 1.5)
        return gamma, beta, mean, var

    w1_t = 0.1 * jax.random.normal(ks[0], (mid, in_channels, 1, 1), jnp.float32)
    b1 = 0.1 * jax.random.normal(ks[1], (mid,), jnp.float32)
    w2_t = 0.1 * jax.random.normal(ks[6], (mid, mid, 3, 3), jnp.float32)
    b2 = 0.1 * jax.random.normal(ks[7], (mid,), jnp.float32)
    w3_t = 0.1 * jax.random.normal(ks[12], (n_filters, mid, 1, 1), jnp.float32)
    b3 = 0.1 * jax.random.normal(ks[13], (n_filters,), jnp.float32)
    return dict(w1_t=w1_t, b1=b1, bn1=bn(ks[2], ks[3], ks[4], ks[5], mid),
                w2_t=w2_t, b2=b2, bn2=bn(ks[8], ks[9], ks[10], ks[11], mid),
                w3_t=w3_t, b3=b3, bn3=bn(ks[14], ks[15], ks[16], ks[17],
                                         n_filters))


# --------------------------- pure-JAX reference ----------------------------- #
def reference(x_nchw, params):
    """Independent XLA reference built straight from the PyTorch-layout params."""
    def bn(y, stats):
        gamma, beta, mean, var = stats
        return (y - mean) * (gamma / jnp.sqrt(var + _EPS)) + beta

    x = jnp.transpose(x_nchw, (0, 2, 3, 1))
    y = jnp.einsum("nhwc,oc->nhwo", x, params["w1_t"][:, :, 0, 0]) + params["b1"]
    y = jnp.maximum(bn(y, params["bn1"]), 0.0)

    # ConvTranspose2d(mid, mid, 3, stride=2, padding=1, output_padding=1)
    # == lhs-dilated VALID conv with spatially flipped kernel, pad (1, 2).
    w2 = jnp.transpose(params["w2_t"], (2, 3, 0, 1))[::-1, ::-1]
    y = lax.conv_general_dilated(
        y, w2, window_strides=(1, 1), padding=((1, 2), (1, 2)),
        lhs_dilation=(2, 2), dimension_numbers=("NHWC", "HWIO", "NHWC"))
    y = jnp.maximum(bn(y + params["b2"], params["bn2"]), 0.0)

    y = jnp.einsum("nhwc,oc->nhwo", y, params["w3_t"][:, :, 0, 0]) + params["b3"]
    y = jnp.maximum(bn(y, params["bn3"]), 0.0)
    return jnp.transpose(y, (0, 3, 1, 2))


if __name__ == "__main__":
    N, C_IN, H, W = 2, 16, 16, 16          # in_channels=16 -> mid=4
    N_FILTERS = 8
    key = jax.random.PRNGKey(0)
    kx, kp = jax.random.split(key)
    x = jax.random.normal(kx, (N, C_IN, H, W), jnp.float32)   # NCHW input
    params = make_params(kp, C_IN, N_FILTERS)

    out = jax.block_until_ready(jax.jit(decoder_block)(x, params))

    ref = reference(x, params)
    assert out.shape == (N, N_FILTERS, 2 * H, 2 * W), out.shape
    max_err = float(jnp.max(jnp.abs(out - ref)))
    assert jnp.allclose(out, ref, rtol=1e-4, atol=1e-4), max_err
    print("KERNEL_OK")
</pallas_src>

<mosaic_0001>
module attributes {stable_mosaic.version = 11 : i64} {
  func.func @_decoder_block_kernel(%arg0: i32, %arg1: i32, %arg2: memref<1x8x16x16xf32, #tpu.memory_space<vmem>>, %arg3: memref<1x1x16x16xf32, #tpu.memory_space<vmem>>, %arg4: memref<16x4xf32, #tpu.memory_space<vmem>>, %arg5: memref<1x4xf32, #tpu.memory_space<vmem>>, %arg6: memref<9x4x4xf32, #tpu.memory_space<vmem>>, %arg7: memref<1x4xf32, #tpu.memory_space<vmem>>, %arg8: memref<4x8xf32, #tpu.memory_space<vmem>>, %arg9: memref<1x8xf32, #tpu.memory_space<vmem>>, %arg10: memref<1x4x128x8xf32, #tpu.memory_space<vmem>>) attributes {dimension_semantics = [#tpu.dimension_semantics<parallel>, #tpu.dimension_semantics<parallel>], iteration_bounds = array<i64: 2, 2>, scalar_prefetch = 0 : i64, scratch_operands = 0 : i64, tpu.core_type = #tpu.core_type<tc>, window_params = [{transform_indices = @transform_0, window_bounds = array<i64: 1, 8, 16, 16>}, {transform_indices = @transform_1, window_bounds = array<i64: 1, 1, 16, 16>}, {pipeline_mode = #tpu.pipeline_mode<synchronous>, transform_indices = @transform_2, window_bounds = array<i64: 16, 4>}, {pipeline_mode = #tpu.pipeline_mode<synchronous>, transform_indices = @transform_3, window_bounds = array<i64: 1, 4>}, {pipeline_mode = #tpu.pipeline_mode<synchronous>, transform_indices = @transform_4, window_bounds = array<i64: 9, 4, 4>}, {pipeline_mode = #tpu.pipeline_mode<synchronous>, transform_indices = @transform_5, window_bounds = array<i64: 1, 4>}, {pipeline_mode = #tpu.pipeline_mode<synchronous>, transform_indices = @transform_6, window_bounds = array<i64: 4, 8>}, {pipeline_mode = #tpu.pipeline_mode<synchronous>, transform_indices = @transform_7, window_bounds = array<i64: 1, 8>}, {transform_indices = @transform_8, window_bounds = array<i64: 1, 4, 128, 8>}]} {
    %c0 = arith.constant 0 : index
    %c0_0 = arith.constant 0 : index
    %0 = vector.load %arg4[%c0, %c0_0] : memref<16x4xf32, #tpu.memory_space<vmem>>, vector<16x4xf32>
    %c0_1 = arith.constant 0 : index
    %c0_2 = arith.constant 0 : index
    %1 = vector.load %arg5[%c0_1, %c0_2] : memref<1x4xf32, #tpu.memory_space<vmem>>, vector<1x4xf32>
    %c0_3 = arith.constant 0 : index
    %c0_4 = arith.constant 0 : index
    %c0_5 = arith.constant 0 : index
    %c0_6 = arith.constant 0 : index
    %2 = vector.load %arg2[%c0_3, %c0_4, %c0_5, %c0_6] : memref<1x8x16x16xf32, #tpu.memory_space<vmem>>, vector<1x8x16x16xf32>
    %3 = vector.shape_cast %2 : vector<1x8x16x16xf32> to vector<8x16x16xf32>
    %4 = vector.shape_cast %3 : vector<8x16x16xf32> to vector<128x16xf32>
    %cst = arith.constant dense<0.000000e+00> : vector<128x4xf32>
    %5 = tpu.matmul %4, %0, %cst {dimension_numbers = #tpu.dot_dimension_numbers<[1], [0], [0], [1], [0, 0, 1, 1], [], []>} : vector<128x16xf32>, vector<16x4xf32>, vector<128x4xf32> -> vector<128x4xf32>
    %6 = vector.broadcast %1 : vector<1x4xf32> to vector<128x4xf32>
    %7 = arith.addf %5, %6 : vector<128x4xf32>
    %cst_7 = arith.constant 0.000000e+00 : f32
    %8 = vector.broadcast %cst_7 : f32 to vector<128x4xf32>
    %9 = arith.maximumf %7, %8 : vector<128x4xf32>
    %10 = vector.shape_cast %9 : vector<128x4xf32> to vector<8x16x4xf32>
    %c0_8 = arith.constant 0 : index
    %c0_9 = arith.constant 0 : index
    %c0_10 = arith.constant 0 : index
    %c0_11 = arith.constant 0 : index
    %11 = vector.load %arg3[%c0_8, %c0_9, %c0_10, %c0_11] : memref<1x1x16x16xf32, #tpu.memory_space<vmem>>, vector<1x1x16x16xf32>
    %12 = vector.shape_cast %11 : vector<1x1x16x16xf32> to vector<1x16x16xf32>
    %13 = vector.shape_cast %12 : vector<1x16x16xf32> to vector<16x16xf32>
    %cst_12 = arith.constant dense<0.000000e+00> : vector<16x4xf32>
    %14 = tpu.matmul %13, %0, %cst_12 {dimension_numbers = #tpu.dot_dimension_numbers<[1], [0], [0], [1], [0, 0, 1, 1], [], []>} : vector<16x16xf32>, vector<16x4xf32>, vector<16x4xf32> -> vector<16x4xf32>
    %15 = vector.broadcast %1 : vector<1x4xf32> to vector<16x4xf32>
    %16 = arith.addf %14, %15 : vector<16x4xf32>
    %cst_13 = arith.constant 0.000000e+00 : f32
    %17 = vector.broadcast %cst_13 : f32 to vector<16x4xf32>
    %18 = arith.maximumf %16, %17 : vector<16x4xf32>
    %c1_i32 = arith.constant 1 : i32
    %19 = arith.cmpi eq, %arg1, %c1_i32 : i32
    %cst_14 = arith.constant 0.000000e+00 : f32
    %cst_15 = arith.constant 1.000000e+00 : f32
    %20 = arith.select %19, %cst_14, %cst_15 : f32
    %21 = vector.broadcast %20 : f32 to vector<16x4xf32>
    %22 = arith.mulf %18, %21 : vector<16x4xf32>
    %23 = vector.shape_cast %22 : vector<16x4xf32> to vector<1x16x4xf32>
    %24 = vector.extract_strided_slice %10 {offsets = [1, 0, 0], sizes = [7, 16, 4], strides = [1, 1, 1]} : vector<8x16x4xf32> to vector<7x16x4xf32>
    %25 = tpu.concatenate %24, %23 in 0 : vector<7x16x4xf32>, vector<1x16x4xf32> -> vector<8x16x4xf32>
    %cst_16 = arith.constant 0.000000e+00 : f32
    %26 = vector.broadcast %cst_16 : f32 to vector<8x1x4xf32>
    %27 = vector.extract_strided_slice %10 {offsets = [0, 1, 0], sizes = [8, 15, 4], strides = [1, 1, 1]} : vector<8x16x4xf32> to vector<8x15x4xf32>
    %28 = tpu.concatenate %27, %26 in 1 : vector<8x15x4xf32>, vector<8x1x4xf32> -> vector<8x16x4xf32>
    %29 = vector.extract_strided_slice %25 {offsets = [0, 1, 0], sizes = [8, 15, 4], strides = [1, 1, 1]} : vector<8x16x4xf32> to vector<8x15x4xf32>
    %30 = tpu.concatenate %29, %26 in 1 : vector<8x15x4xf32>, vector<8x1x4xf32> -> vector<8x16x4xf32>
    %31 = vector.shape_cast %10 : vector<8x16x4xf32> to vector<128x4xf32>
    %32 = vector.shape_cast %25 : vector<8x16x4xf32> to vector<128x4xf32>
    %33 = vector.shape_cast %28 : vector<8x16x4xf32> to vector<128x4xf32>
    %34 = vector.shape_cast %30 : vector<8x16x4xf32> to vector<128x4xf32>
    %c0_17 = arith.constant 0 : index
    %c0_18 = arith.constant 0 : index
    %35 = vector.load %arg7[%c0_17, %c0_18] : memref<1x4xf32, #tpu.memory_space<vmem>>, vector<1x4xf32>
    %c4 = arith.constant 4 : index
    %c0_19 = arith.constant 0 : index
    %c0_20 = arith.constant 0 : index
    %36 = vector.load %arg6[%c4, %c0_19, %c0_20] : memref<9x4x4xf32, #tpu.memory_space<vmem>>, vector<1x4x4xf32>
    %37 = vector.shape_cast %36 : vector<1x4x4xf32> to vector<4x4xf32>
    %cst_21 = arith.constant dense<0.000000e+00> : vector<128x4xf32>
    %38 = tpu.matmul %31, %37, %cst_21 {dimension_numbers = #tpu.dot_dimension_numbers<[1], [0], [0], [1], [0, 0, 1, 1], [], []>} : vector<128x4xf32>, vector<4x4xf32>, vector<128x4xf32> -> vector<128x4xf32>
    %39 = vector.broadcast %35 : vector<1x4xf32> to vector<128x4xf32>
    %40 = arith.addf %39, %38 : vector<128x4xf32>
    %cst_22 = arith.constant 0.000000e+00 : f32
    %41 = vector.broadcast %cst_22 : f32 to vector<128x4xf32>
    %42 = arith.maximumf %40, %41 : vector<128x4xf32>
    %c5 = arith.constant 5 : index
    %c0_23 = arith.constant 0 : index
    %c0_24 = arith.constant 0 : index
    %43 = vector.load %arg6[%c5, %c0_23, %c0_24] : memref<9x4x4xf32, #tpu.memory_space<vmem>>, vector<1x4x4xf32>
    %44 = vector.shape_cast %43 : vector<1x4x4xf32> to vector<4x4xf32>
    %cst_25 = arith.constant dense<0.000000e+00> : vector<128x4xf32>
    %45 = tpu.matmul %31, %44, %cst_25 {dimension_numbers = #tpu.dot_dimension_numbers<[1], [0], [0], [1], [0, 0, 1, 1], [], []>} : vector<128x4xf32>, vector<4x4xf32>, vector<128x4xf32> -> vector<128x4xf32>
    %46 = vector.broadcast %35 : vector<1x4xf32> to vector<128x4xf32>
    %47 = arith.addf %46, %45 : vector<128x4xf32>
    %c3 = arith.constant 3 : index
    %c0_26 = arith.constant 0 : index
    %c0_27 = arith.constant 0 : index
    %48 = vector.load %arg6[%c3, %c0_26, %c0_27] : memref<9x4x4xf32, #tpu.memory_space<vmem>>, vector<1x4x4xf32>
    %49 = vector.shape_cast %48 : vector<1x4x4xf32> to vector<4x4xf32>
    %cst_28 = arith.constant dense<0.000000e+00> : vector<128x4xf32>
    %50 = tpu.matmul %33, %49, %cst_28 {dimension_numbers = #tpu.dot_dimension_numbers<[1], [0], [0], [1], [0, 0, 1, 1], [], []>} : vector<128x4xf32>, vector<4x4xf32>, vector<128x4xf32> -> vector<128x4xf32>
    %51 = arith.addf %47, %50 : vector<128x4xf32>
    %cst_29 = arith.constant 0.000000e+00 : f32
    %52 = vector.broadcast %cst_29 : f32 to vector<128x4xf32>
    %53 = arith.maximumf %51, %52 : vector<128x4xf32>
    %c7 = arith.constant 7 : index
    %c0_30 = arith.constant 0 : index
    %c0_31 = arith.constant 0 : index
    %54 = vector.load %arg6[%c7, %c0_30, %c0_31] : memref<9x4x4xf32, #tpu.memory_space<vmem>>, vector<1x4x4xf32>
    %55 = vector.shape_cast %54 : vector<1x4x4xf32> to vector<4x4xf32>
    %cst_32 = arith.constant dense<0.000000e+00> : vector<128x4xf32>
    %56 = tpu.matmul %31, %55, %cst_32 {dimension_numbers = #tpu.dot_dimension_numbers<[1], [0], [0], [1], [0, 0, 1, 1], [], []>} : vector<128x4xf32>, vector<4x4xf32>, vector<128x4xf32> -> vector<128x4xf32>
    %57 = vector.broadcast %35 : vector<1x4xf32> to vector<128x4xf32>
    %58 = arith.addf %57, %56 : vector<128x4xf32>
    %c1 = arith.constant 1 : index
    %c0_33 = arith.constant 0 : index
    %c0_34 = arith.constant 0 : index
    %59 = vector.load %arg6[%c1, %c0_33, %c0_34] : memref<9x4x4xf32, #tpu.memory_space<vmem>>, vector<1x4x4xf32>
    %60 = vector.shape_cast %59 : vector<1x4x4xf32> to vector<4x4xf32>
    %cst_35 = arith.constant dense<0.000000e+00> : vector<128x4xf32>
    %61 = tpu.matmul %32, %60, %cst_35 {dimension_numbers = #tpu.dot_dimension_numbers<[1], [0], [0], [1], [0, 0, 1, 1], [], []>} : vector<128x4xf32>, vector<4x4xf32>, vector<128x4xf32> -> vector<128x4xf32>
    %62 = arith.addf %58, %61 : vector<128x4xf32>
    %cst_36 = arith.constant 0.000000e+00 : f32
    %63 = vector.broadcast %cst_36 : f32 to vector<128x4xf32>
    %64 = arith.maximumf %62, %63 : vector<128x4xf32>
    %c8 = arith.constant 8 : index
    %c0_37 = arith.constant 0 : index
    %c0_38 = arith.constant 0 : index
    %65 = vector.load %arg6[%c8, %c0_37, %c0_38] : memref<9x4x4xf32, #tpu.memory_space<vmem>>, vector<1x4x4xf32>
    %66 = vector.shape_cast %65 : vector<1x4x4xf32> to vector<4x4xf32>
    %cst_39 = arith.constant dense<0.000000e+00> : vector<128x4xf32>
    %67 = tpu.matmul %31, %66, %cst_39 {dimension_numbers = #tpu.dot_dimension_numbers<[1], [0], [0], [1], [0, 0, 1, 1], [], []>} : vector<128x4xf32>, vector<4x4xf32>, vector<128x4xf32> -> vector<128x4xf32>
    %68 = vector.broadcast %35 : vector<1x4xf32> to vector<128x4xf32>
    %69 = arith.addf %68, %67 : vector<128x4xf32>
    %c6 = arith.constant 6 : index
    %c0_40 = arith.constant 0 : index
    %c0_41 = arith.constant 0 : index
    %70 = vector.load %arg6[%c6, %c0_40, %c0_41] : memref<9x4x4xf32, #tpu.memory_space<vmem>>, vector<1x4x4xf32>
    %71 = vector.shape_cast %70 : vector<1x4x4xf32> to vector<4x4xf32>
    %cst_42 = arith.constant dense<0.000000e+00> : vector<128x4xf32>
    %72 = tpu.matmul %33, %71, %cst_42 {dimension_numbers = #tpu.dot_dimension_numbers<[1], [0], [0], [1], [0, 0, 1, 1], [], []>} : vector<128x4xf32>, vector<4x4xf32>, vector<128x4xf32> -> vector<128x4xf32>
    %73 = arith.addf %69, %72 : vector<128x4xf32>
    %c2 = arith.constant 2 : index
    %c0_43 = arith.constant 0 : index
    %c0_44 = arith.constant 0 : index
    %74 = vector.load %arg6[%c2, %c0_43, %c0_44] : memref<9x4x4xf32, #tpu.memory_space<vmem>>, vector<1x4x4xf32>
    %75 = vector.shape_cast %74 : vector<1x4x4xf32> to vector<4x4xf32>
    %cst_45 = arith.constant dense<0.000000e+00> : vector<128x4xf32>
    %76 = tpu.matmul %32, %75, %cst_45 {dimension_numbers = #tpu.dot_dimension_numbers<[1], [0], [0], [1], [0, 0, 1, 1], [], []>} : vector<128x4xf32>, vector<4x4xf32>, vector<128x4xf32> -> vector<128x4xf32>
    %77 = arith.addf %73, %76 : vector<128x4xf32>
    %c0_46 = arith.constant 0 : index
    %c0_47 = arith.constant 0 : index
    %c0_48 = arith.constant 0 : index
    %78 = vector.load %arg6[%c0_46, %c0_47, %c0_48] : memref<9x4x4xf32, #tpu.memory_space<vmem>>, vector<1x4x4xf32>
    %79 = vector.shape_cast %78 : vector<1x4x4xf32> to vector<4x4xf32>
    %cst_49 = arith.constant dense<0.000000e+00> : vector<128x4xf32>
    %80 = tpu.matmul %34, %79, %cst_49 {dimension_numbers = #tpu.dot_dimension_numbers<[1], [0], [0], [1], [0, 0, 1, 1], [], []>} : vector<128x4xf32>, vector<4x4xf32>, vector<128x4xf32> -> vector<128x4xf32>
    %81 = arith.addf %77, %80 : vector<128x4xf32>
    %cst_50 = arith.constant 0.000000e+00 : f32
    %82 = vector.broadcast %cst_50 : f32 to vector<128x4xf32>
    %83 = arith.maximumf %81, %82 : vector<128x4xf32>
    %84 = tpu.concatenate %42, %53, %64, %83 in 0 : vector<128x4xf32>, vector<128x4xf32>, vector<128x4xf32>, vector<128x4xf32> -> vector<512x4xf32>
    %c0_51 = arith.constant 0 : index
    %c0_52 = arith.constant 0 : index
    %85 = vector.load %arg8[%c0_51, %c0_52] : memref<4x8xf32, #tpu.memory_space<vmem>>, vector<4x8xf32>
    %cst_53 = arith.constant dense<0.000000e+00> : vector<512x8xf32>
    %86 = tpu.matmul %84, %85, %cst_53 {dimension_numbers = #tpu.dot_dimension_numbers<[1], [0], [0], [1], [0, 0, 1, 1], [], []>} : vector<512x4xf32>, vector<4x8xf32>, vector<512x8xf32> -> vector<512x8xf32>
    %c0_54 = arith.constant 0 : index
    %c0_55 = arith.constant 0 : index
    %87 = vector.load %arg9[%c0_54, %c0_55] : memref<1x8xf32, #tpu.memory_space<vmem>>, vector<1x8xf32>
    %88 = vector.broadcast %87 : vector<1x8xf32> to vector<512x8xf32>
    %89 = arith.addf %86, %88 : vector<512x8xf32>
    %cst_56 = arith.constant 0.000000e+00 : f32
    %90 = vector.broadcast %cst_56 : f32 to vector<512x8xf32>
    %91 = arith.maximumf %89, %90 : vector<512x8xf32>
    %92 = vector.shape_cast %91 : vector<512x8xf32> to vector<4x128x8xf32>
    %c0_57 = arith.constant 0 : index
    %c0_58 = arith.constant 0 : index
    %c0_59 = arith.constant 0 : index
    %c0_60 = arith.constant 0 : index
    %93 = vector.load %arg10[%c0_57, %c0_58, %c0_59, %c0_60] : memref<1x4x128x8xf32, #tpu.memory_space<vmem>>, vector<1x4x128x8xf32>
    %94 = vector.shape_cast %93 : vector<1x4x128x8xf32> to vector<4x128x8xf32>
    %95 = vector.shape_cast %92 : vector<4x128x8xf32> to vector<1x4x128x8xf32>
    tpu.vector_store %arg10[%c0_57, %c0_58, %c0_59, %c0_60], %95 {strides = array<i32>} : memref<1x4x128x8xf32, #tpu.memory_space<vmem>>, vector<1x4x128x8xf32>,
    return
  }
  func.func @transform_0(%arg0: i32, %arg1: i32) -> (i32, i32, i32, i32) {
    %c0_i32 = arith.constant 0 : i32
    %c0_i32_0 = arith.constant 0 : i32
    %c0_i32_1 = arith.constant 0 : i32
    return %arg0, %arg1, %c0_i32, %c0_i32_0 : i32, i32, i32, i32
  }
  func.func @transform_1(%arg0: i32, %arg1: i32) -> (i32, i32, i32, i32) {
    %c8_i32 = arith.constant 8 : i32
    %0 = arith.muli %arg1, %c8_i32 : i32
    %c8_i32_0 = arith.constant 8 : i32
    %1 = arith.addi %0, %c8_i32_0 : i32
    %c0_i32 = arith.constant 0 : i32
    %c0_i32_1 = arith.constant 0 : i32
    %c0_i32_2 = arith.constant 0 : i32
    return %arg0, %1, %c0_i32, %c0_i32_1 : i32, i32, i32, i32
  }
  func.func @transform_2(%arg0: i32, %arg1: i32) -> (i32, i32) {
    %c0_i32 = arith.constant 0 : i32
    %c0_i32_0 = arith.constant 0 : i32
    %c0_i32_1 = arith.constant 0 : i32
    return %c0_i32, %c0_i32_0 : i32, i32
  }
  func.func @transform_3(%arg0: i32, %arg1: i32) -> (i32, i32) {
    %c0_i32 = arith.constant 0 : i32
    %c0_i32_0 = arith.constant 0 : i32
    %c0_i32_1 = arith.constant 0 : i32
    return %c0_i32, %c0_i32_0 : i32, i32
  }
  func.func @transform_4(%arg0: i32, %arg1: i32) -> (i32, i32, i32) {
    %c0_i32 = arith.constant 0 : i32
    %c0_i32_0 = arith.constant 0 : i32
    %c0_i32_1 = arith.constant 0 : i32
    %c0_i32_2 = arith.constant 0 : i32
    return %c0_i32, %c0_i32_0, %c0_i32_1 : i32, i32, i32
  }
  func.func @transform_5(%arg0: i32, %arg1: i32) -> (i32, i32) {
    %c0_i32 = arith.constant 0 : i32
    %c0_i32_0 = arith.constant 0 : i32
    %c0_i32_1 = arith.constant 0 : i32
    return %c0_i32, %c0_i32_0 : i32, i32
  }
  func.func @transform_6(%arg0: i32, %arg1: i32) -> (i32, i32) {
    %c0_i32 = arith.constant 0 : i32
    %c0_i32_0 = arith.constant 0 : i32
    %c0_i32_1 = arith.constant 0 : i32
    return %c0_i32, %c0_i32_0 : i32, i32
  }
  func.func @transform_7(%arg0: i32, %arg1: i32) -> (i32, i32) {
    %c0_i32 = arith.constant 0 : i32
    %c0_i32_0 = arith.constant 0 : i32
    %c0_i32_1 = arith.constant 0 : i32
    return %c0_i32, %c0_i32_0 : i32, i32
  }
  func.func @transform_8(%arg0: i32, %arg1: i32) -> (i32, i32, i32, i32) {
    %c0_i32 = arith.constant 0 : i32
    %c0_i32_0 = arith.constant 0 : i32
    %c0_i32_1 = arith.constant 0 : i32
    return %arg0, %c0_i32, %arg1, %c0_i32_0 : i32, i32, i32, i32
  }
}

</mosaic_0001>

<bundles_post_ra>
// kernel: decoder_block.1
= control target key start
LH: loop header
LB: loop body
LE: loop exit
PB: predicated region body
PF: predicated region fallthrough
CT: control target
= control target key end

     0   :  { %s5802_s0 = inlined_call_operand.vmem [shape: f32[2,17,16,16], index: 0, kind: input, shape index: {}, may-alias: {0,1}]   ;;  %s5803_s1 = inlined_call_operand.vmem [shape: f32[2,17,16,16], index: 1, kind: input, shape index: {}, may-alias: {0,1}]   ;;  %s5804_s2 = inlined_call_operand.vmem [shape: f32[16,4], index: 2, kind: input, shape index: {}]   ;;  %s5805_s3 = inlined_call_operand.vmem [shape: f32[1,4], index: 3, kind: input, shape index: {}]   ;;  %s5806_s4 = inlined_call_operand.vmem [shape: f32[9,4,4], index: 4, kind: input, shape index: {}]   ;;  %s5807_s5 = inlined_call_operand.vmem [shape: f32[1,4], index: 5, kind: input, shape index: {}]   ;;  %s5808_s6 = inlined_call_operand.vmem [shape: f32[4,8], index: 6, kind: input, shape index: {}]   ;;  %s5809_s7 = inlined_call_operand.vmem [shape: f32[1,8], index: 7, kind: input, shape index: {}]   ;;  %s5810_s8 = inlined_call_operand.vmem [shape: f32[2,4,256,8], index: 8, kind: output, shape index: {}]  }
   0x1   :  { %5811 = sst [smem:[#allocation3_spill]] %s5804_s2 }
   0x2   :  { %s4719_s27 = smov 0   ;;  %s4721_s28 = smov 0  }
   0x3   :  { %s4723_s29 = smov 0   ;;  %s4725_s30 = smov 0  }
   0x4   :  { %s4727_s9 = smov 0   ;;  %s4729_s10 = smov 0  }
   0x5   :  { %s4731_s11 = smov 0  }
   0x6 LB: > { %s27_s12 = sadd.s32 1, %s4664_s9  ;;  %s30_s13 = sadd.s32 1, %s4668_s10  ;;  %s4672_s11 = sphi %s4731_s11, %s18_s11   ;;  %s4668_s10 = sphi %s4729_s10, %s5819_s10   ;;  %s4664_s9 = sphi %s4727_s9, %s5818_s9   ;;  %s4660_s30 = sphi %s4725_s30, %s5817_s30   ;;  %s4656_s29 = sphi %s4723_s29, %s5816_s29   ;;  %s4652_s28 = sphi %s4721_s28, %s5815_s28   ;;  %s4648_s27 = sphi %s4719_s27, %s5814_s27  }
   0x7   : > { %p28_p0 = scmp.ge.s32.totalorder %s27_s12, 2  ;;  %s3551_s14 = sadd.s32 4294967295, %s4672_s11  }
   0x8   : > { %p235_p1 = scmp.ne.s32.totalorder %s4652_s28, %s4648_s27  ;;  %p236_p2 = scmp.eq.s32.totalorder %s3551_s14, 3 }
   0x9   : > { %s5821_s12 = smov (%p28_p0, %s27_s12), 0  ;;  %s5823_s13 = smov (!%p28_p0, %s30_s13), %s4668_s10 }
   0xa   : > { %s221_s15 = ssub.s32 %s4664_s9, %s5821_s12  ;;  %p32_p3 = scmp.ge.s32.totalorder %s5823_s13, 2 }
   0xb   : > { %p3557_p4 = scmp.ge.s32.totalorder %s4672_s11, 1  ;;  %p4765_p5 = por %p236_p2, %p235_p1 }
   0xc   : > { %p318_p6 = scmp.lt.s32.totalorder %s4672_s11, 5  ;;  %s5825_s13 = smov (%p32_p3, %s5823_s13), 0 }
   0xd   : > { %s220_s17 = ssub.s32 %s4668_s10, %s5825_s13  ;;  %s225_s19 = sadd.s32 1, %s4652_s28 }
   0xe   : > { %p319_p7 = pnand %p3557_p4, %p318_p6  ;;  %s222_s18 = sor.u32 %s221_s15, %s220_s17 }
   0xf   : > { %p223_p8 = scmp.eq.s32.totalorder %s222_s18, 0  ;;  %s5813_s2 = sld [smem:[#allocation3_spill]] (!%p319_p7)  ;;  %vm832_vm0 = vcmask (!%p319_p7), 1043456   ;;  %v3603_v3 = vld [vmem:[%s5806_s4 + $0x14] sm:$0xf] (!%p319_p7)  ;;  %vm432_vm1 = vcmask (!%p319_p7), 130048  }
  0x10   : > { %322 = sbr.rel (%p319_p7) target bundleno = 882 (0x372), region = 52  ;;  %s3559_s25 = sshll.u32 (!%p319_p7), %s4656_s29, 3  ;;  %v3584_v22 = vld [vmem:[%s5806_s4 + $0x10] sm:$0xf] (!%p319_p7)  ;;  %v3621_v23 = vld [vmem:[%s5806_s4 + $0xc] sm:$0xf] (!%p319_p7) }
  0x11   : > { %s4776_s20 = scalar_select %p223_p8, %s4652_s28, %s225_s19  }
  0x12   : > { %p378_p9 = scmp.lt.s32.totalorder (!%p319_p7), %s4660_s30, 1  ;;  %p380_p10 = scmp.lt.s32.totalorder (!%p319_p7), %s3559_s25, 16  ;;  %v3639_v24 = vld [vmem:[%s5806_s4 + $0x1c] sm:$0xf] (!%p319_p7)  ;;  %v4850_v25 = vld [vmem:[%s5805_s3] ss:$0 sm:$0xff] (!%p319_p7) }
  0x13   : > { %s394_s26 = sadd.s32 (!%p319_p7), 8, %s3559_s25  ;;  %vm799_vm2 = vcmask (!%p319_p7), 31744   ;;  %vm748_vm3 = vcmask (!%p319_p7), 1046528   ;;  %v4869_v38 = vld [vmem:[%s5806_s4 + $0x20] sm:$0xf] (!%p319_p7)  ;;  %p727_p12 = scmp.eq.s32.totalorder (!%p319_p7), %s4656_s29, 1 }
  0x14   : > { %p397_p11 = scmp.lt.s32.totalorder (!%p319_p7), %s394_s26, 16  ;;  %v4874_v39 = vld [vmem:[%s5806_s4 + $0x4] sm:$0xf] (!%p319_p7)  ;;  %vm3095_vm4 = vcmask (!%p319_p7), 64512  }
  0x15   : > { %v407_v0 = vld [vmem:[%s5813_s2] sm:$0xff] (!%p319_p7)  ;;  %v408_v1 = vld [vmem:[%s5813_s2 + $0x8] sm:$0xff] (!%p319_p7) }
  0x16   : > { %v4425_v2 = vpack.c.bf16 (!%p319_p7), %v408_v1, %v407_v0 }
  0x17   : > { %s379_s14 = scalar_select %p378_p9, %s4660_s30, 1 }
  0x18   : > { %4426 = vmatprep.subr.bf16.mxu0 %v4425_v2  ;;  %s5827_s25 = smov (!%p380_p10, %s3559_s25), 16  ;;  %4430 = vmatprep.subr.bf16.mxu1 %v4425_v2  ;;  %s5829_s26 = smov (!%p397_p11, %s394_s26), 16 }
  0x19   : > { %4428 = vmatpush3.bf16.msra.mxu0 %v4425_v2  ;;  %s4561_s18 = smul.u32 34, %s379_s14  ;;  %4432 = vmatpush3.bf16.msra.mxu1 %v4425_v2  ;;  %s3560_s19 = sshll.u32 %s5827_s25, 1 }
  0x1a   : > { %4119 = vmatprep.subr.msk.mxu0 %vm832_vm0, %v3603_v3  ;;  %s3563_s25 = sshll.u32 %s5829_s26, 1  ;;  %4093 = vmatprep.subr.msk.mxu1 %vm832_vm0, %v3584_v22 }
  0x1b   : > { %s384_s21 = sadd.s32 %s4561_s18, %s3560_s19  ;;  %s401_s14 = sadd.s32 %s4561_s18, %s3563_s25 }
  0x1c   : > { %s3561_s22 = sshll.u32 %s384_s21, 3  ;;  %s3564_s15 = sshll.u32 %s401_s14, 3 }
  0x1d   : > { %s4794_s2 = scalar_lea.vmem %s5802_s0, %s3561_s22  ;;  %s403_s21 = scalar_lea.vmem %s5803_s1, %s3564_s15 }
  0x1e   : > { %v410_v4 = vld [vmem:[%s4794_s2] sm:$0xff]  ;;  %v411_v5 = vld [vmem:[%s4794_s2 + $0x8] sm:$0xff]  ;;  %v412_v6 = vld [vmem:[%s4794_s2 + $0x10] sm:$0xff]  ;;  %s728_s24 = scalar_select %p727_p12, 0.0, 1.0 }
  0x1f   : > { %4062 = vmatprep.mubr.msk.f32.mxu0 %vm432_vm1, %v410_v4  ;;  %v413_v7 = vld [vmem:[%s4794_s2 + $0x18] sm:$0xff]  ;;  %v414_v8 = vld [vmem:[%s4794_s2 + $0x20] sm:$0xff]  ;;  %v643_v10 = vld [vmem:[%s403_s21 + $0x8] sm:$0xff] }
  0x20   : > { %4063 = vmatmul.mubr.msk.f32.vlgmr.msra.gmra.mrb[0].mxu0 %vm432_vm1, %v411_v5  ;;  %v642_v9 = vld [vmem:[%s403_s21] sm:$0xff]  ;;  %v415_v11 = vld [vmem:[%s4794_s2 + $0x28] sm:$0xff]  ;;  %v416_v12 = vld [vmem:[%s4794_s2 + $0x30] sm:$0xff]  ;;  %s369_s21 = sand.u32 1, %s4648_s27   ;;  %s3813_s27 = sshll.u32 (%p4765_p5), %s4656_s29, 4 }
  0x21   : > { %4065 = vmatprep.mubr.msk.f32.mxu0 %vm432_vm1, %v412_v6  ;;  %4120 = vmatpush3.msk.msra.mxu0 %vm832_vm0, %v3603_v3  ;;  %v417_v13 = vld [vmem:[%s4794_s2 + $0x38] sm:$0xff]  ;;  %v418_v14 = vld [vmem:[%s4794_s2 + $0x40] sm:$0xff]  ;;  %v419_v15 = vld [vmem:[%s4794_s2 + $0x48] sm:$0xff]  ;;  %s3558_s22 = sshll.u32 %s369_s21, 9 }
  0x22   : > { %4090 = vmatprep.mubr.msk.f32.mxu1 %vm432_vm1, %v642_v9  ;;  %v420_v16 = vld [vmem:[%s4794_s2 + $0x50] sm:$0xff]  ;;  %v421_v17 = vld [vmem:[%s4794_s2 + $0x58] sm:$0xff]  ;;  %v422_v18 = vld [vmem:[%s4794_s2 + $0x60] sm:$0xff]  ;;  %4145 = vmatprep.subr.msk.mxu0 %vm832_vm0, %v3621_v23  ;;  %s5452_s23 = scalar_lea.vmem [#allocation2], %s3558_s22 }
  0x23   : > { %4091 = vmatmul.mubr.msk.f32.vlgmr.msra.gmra.mrb[0].mxu1 %vm432_vm1, %v643_v10  ;;  %v423_v19 = vld [vmem:[%s4794_s2 + $0x68] sm:$0xff]  ;;  %v424_v20 = vld [vmem:[%s4794_s2 + $0x70] sm:$0xff]  ;;  %v425_v21 = vld [vmem:[%s4794_s2 + $0x78] sm:$0xff] }
  0x24   : > { %4066 = vmatmul.mubr.msk.f32.gmra.mrb[2].mxu0 %vm432_vm1, %v413_v7  ;;  %4094 = vmatpush3.msk.msra.mxu1 %vm832_vm0, %v3584_v22 }
  0x25   : > { %4068 = vmatprep.mubr.msk.f32.mxu0 %vm432_vm1, %v414_v8  ;;  %4171 = vmatprep.subr.msk.mxu1 %vm832_vm0, %v3639_v24 }
  0x28   : > { %4069 = vmatmul.mubr.msk.f32.gmra.mrb[4].mxu0 %vm432_vm1, %v415_v11 }
  0x29   : > { %4071 = vmatprep.mubr.msk.f32.mxu0 %vm432_vm1, %v416_v12 }
  0x2c   : > { %4072 = vmatmul.mubr.msk.f32.gmra.mrb[6].mxu0 %vm432_vm1, %v417_v13 }
  0x2d   : > { %4074 = vmatprep.mubr.msk.f32.mxu0 %vm432_vm1, %v418_v14 }
  0x30   : > { %4075 = vmatmul.mubr.msk.f32.gmra.mrb[8].mxu0 %vm432_vm1, %v419_v15 }
  0x31   : > { %4077 = vmatprep.mubr.msk.f32.mxu0 %vm432_vm1, %v420_v16 }
  0x34   : > { %4078 = vmatmul.mubr.msk.f32.gmra.mrb[10].mxu0 %vm432_vm1, %v421_v17 }
  0x35   : > { %4080 = vmatprep.mubr.msk.f32.mxu0 %vm432_vm1, %v422_v18 }
  0x38   : > { %4081 = vmatmul.mubr.msk.f32.gmra.mrb[12].mxu0 %vm432_vm1, %v423_v19 }
  0x39   : > { %4083 = vmatprep.mubr.msk.f32.mxu0 %vm432_vm1, %v424_v20 }
  0x3c   : > { %4084 = vmatmul.mubr.msk.f32.gmra.mrb[14].mxu0 %vm432_vm1, %v425_v21 }
  0xf3   : > { %v4064_v26 = vpop.f32.mrb[0].mxu0 }
  0xf4   : > { %v553_v27 = vadd.f32 %v4064_v26, %v4850_v25  ;;  %v547_v28 = vpop.f32.mrb[1].mxu0 }
  0xf5   : > { %v548_v29 = vadd.f32 %v4850_v25, %v547_v28 }
  0xf6   : > { %v4854_v30 = vmax.f32 %v553_v27, 0.0  ;;  %v4092_v40 = vpop.f32.mrb[0].mxu1 }
  0xf7   : > { %v4856_v31 = vmax.f32 %v548_v29, 0.0  ;;  %v4067_v32 = vpop.f32.mrb[2].mxu0  ;;  %v4881_v41 = vadd.f32 %v4092_v40, %v4850_v25  ;;  %v716_v42 = vpop.f32.mrb[1].mxu1 }
  0xf8   : > { %v563_v33 = vadd.f32 %v4067_v32, %v4850_v25  ;;  %v557_v34 = vpop.f32.mrb[3].mxu0  ;;  %v750_v35 = vrot.slane %v4854_v30, 1  ;;  %v4893_v46 = vadd.f32 %v4850_v25, %v716_v42 }
  0xf9   : > { %v558_v36 = vadd.f32 %v4850_v25, %v557_v34  ;;  %4095 = vmatprep.mubr.msk.f32.mxu1 %vm799_vm2, %v4856_v31  ;;  %4121 = vmatprep.mubr.msk.f32.mxu0 %vm799_vm2, %v4856_v31  ;;  %v749_v37 = vrot.slane %v4856_v31, 1 }
  0xfa   : > { %4096 = vmatmul.mubr.msk.f32.vlgmr.msra.gmra.mrb[2].mxu1 %vm799_vm2, %v4854_v30  ;;  %4122 = vmatmul.mubr.msk.f32.vlgmr.msra.gmra.mrb[16].mxu0 %vm799_vm2, %v4854_v30  ;;  %v4895_v47 = vmax.f32 %v563_v33, 0.0  ;;  %v5002_v21 = vsel %vm748_vm3, %v750_v35, 0.0 }
  0xfb   : > { %v4883_v43 = vmax.f32 %v558_v36, 0.0  ;;  %4146 = vmatpush3.msk.msra.mxu0 %vm832_vm0, %v3621_v23  ;;  %v4070_v44 = vpop.f32.mrb[4].mxu0  ;;  %v4889_v45 = vsel %vm748_vm3, %v749_v37, %v750_v35  ;;  %4172 = vmatpush3.msk.msra.mxu1 %vm832_vm0, %v3639_v24 }
  0xfc   : > { %v573_v48 = vadd.f32 %v4070_v44, %v4850_v25  ;;  %v567_v49 = vpop.f32.mrb[5].mxu0  ;;  %4223 = vmatprep.subr.msk.mxu0 %vm832_vm0, %v4869_v38  ;;  %4197 = vmatprep.subr.msk.mxu1 %vm832_vm0, %v4874_v39  ;;  %v753_v20 = vrot.slane %v4895_v47, 1 }
  0xfd   : > { %v568_v50 = vadd.f32 %v4850_v25, %v567_v49  ;;  %4098 = vmatprep.mubr.msk.f32.mxu1 %vm799_vm2, %v4883_v43  ;;  %4124 = vmatprep.mubr.msk.f32.mxu0 %vm799_vm2, %v4883_v43  ;;  %v752_v19 = vrot.slane %v4883_v43, 1 }
  0xfe   : > { %4099 = vmatmul.mubr.msk.f32.gmra.mrb[4].mxu1 %vm799_vm2, %v4895_v47  ;;  %4125 = vmatmul.mubr.msk.f32.gmra.mrb[18].mxu0 %vm799_vm2, %v4895_v47  ;;  %v4913_v53 = vmax.f32 %v573_v48, 0.0  ;;  %v5025_v26 = vsel %vm748_vm3, %v753_v20, 0.0 }
  0xff   : > { %v4911_v51 = vmax.f32 %v568_v50, 0.0  ;;  %v4073_v52 = vpop.f32.mrb[6].mxu0  ;;  %v5009_v22 = vsel %vm748_vm3, %v752_v19, %v753_v20 }
 0x100   : > { %v583_v54 = vadd.f32 %v4073_v52, %v4850_v25  ;;  %v577_v55 = vpop.f32.mrb[7].mxu0  ;;  %v756_v24 = vrot.slane %v4913_v53, 1 }
 0x101   : > { %v578_v56 = vadd.f32 %v4850_v25, %v577_v55  ;;  %4101 = vmatprep.mubr.msk.f32.mxu1 %vm799_vm2, %v4911_v51  ;;  %4127 = vmatprep.mubr.msk.f32.mxu0 %vm799_vm2, %v4911_v51  ;;  %v755_v23 = vrot.slane %v4911_v51, 1 }
 0x102   : > { %4102 = vmatmul.mubr.msk.f32.gmra.mrb[6].mxu1 %vm799_vm2, %v4913_v53  ;;  %4128 = vmatmul.mubr.msk.f32.gmra.mrb[20].mxu0 %vm799_vm2, %v4913_v53  ;;  %v4927_v59 = vmax.f32 %v583_v54, 0.0  ;;  %v5042_v32 = vsel %vm748_vm3, %v756_v24, 0.0 }
 0x103   : > { %v4925_v57 = vmax.f32 %v578_v56, 0.0  ;;  %v4076_v58 = vpop.f32.mrb[8].mxu0  ;;  %v5033_v27 = vsel %vm748_vm3, %v755_v23, %v756_v24 }
 0x104   : > { %v593_v60 = vadd.f32 %v4076_v58, %v4850_v25  ;;  %v587_v61 = vpop.f32.mrb[9].mxu0  ;;  %v759_v29 = vrot.slane %v4927_v59, 1 }
 0x105   : > { %v588_v62 = vadd.f32 %v4850_v25, %v587_v61  ;;  %4104 = vmatprep.mubr.msk.f32.mxu1 %vm799_vm2, %v4925_v57  ;;  %4130 = vmatprep.mubr.msk.f32.mxu0 %vm799_vm2, %v4925_v57  ;;  %v758_v28 = vrot.slane %v4925_v57, 1  ;;  %v726_v61 = vmax.f32 %v4881_v41, 0.0  ;;  %v2443_v41 = vld [vmem:[%s5808_s6] sm:$0xf] }
 0x106   : > { %4105 = vmatmul.mubr.msk.f32.gmra.mrb[8].mxu1 %vm799_vm2, %v4927_v59  ;;  %4131 = vmatmul.mubr.msk.f32.gmra.mrb[22].mxu0 %vm799_vm2, %v4927_v59  ;;  %v4941_v1 = vmax.f32 %v593_v60, 0.0  ;;  %v5058_v36 = vsel %vm748_vm3, %v759_v29, 0.0  ;;  %v3711_v60 = vld [vmem:[%s5806_s4 + $0x8] sm:$0xf] }
 0x107   : > { %v4939_v63 = vmax.f32 %v588_v62, 0.0  ;;  %v4079_v0 = vpop.f32.mrb[10].mxu0  ;;  %v5049_v33 = vsel %vm748_vm3, %v758_v28, %v759_v29 }
 0x108   : > { %v603_v2 = vadd.f32 %v4079_v0, %v4850_v25  ;;  %v597_v3 = vpop.f32.mrb[11].mxu0  ;;  %v762_v35 = vrot.slane %v4941_v1, 1 }
 0x109   : > { %v598_v4 = vadd.f32 %v4850_v25, %v597_v3  ;;  %4107 = vmatprep.mubr.msk.f32.mxu1 %vm799_vm2, %v4939_v63  ;;  %4133 = vmatprep.mubr.msk.f32.mxu0 %vm799_vm2, %v4939_v63  ;;  %v761_v34 = vrot.slane %v4939_v63, 1 }
 0x10a   : > { %4108 = vmatmul.mubr.msk.f32.gmra.mrb[10].mxu1 %vm799_vm2, %v4941_v1  ;;  %4134 = vmatmul.mubr.msk.f32.gmra.mrb[24].mxu0 %vm799_vm2, %v4941_v1  ;;  %v4955_v7 = vmax.f32 %v603_v2, 0.0  ;;  %v5074_v40 = vsel %vm748_vm3, %v762_v35, 0.0 }
 0x10b   : > { %v4953_v5 = vmax.f32 %v598_v4, 0.0  ;;  %v4082_v6 = vpop.f32.mrb[12].mxu0  ;;  %v5065_v37 = vsel %vm748_vm3, %v761_v34, %v762_v35 }
 0x10c   : > { %v613_v8 = vadd.f32 %v4082_v6, %v4850_v25  ;;  %v607_v9 = vpop.f32.mrb[13].mxu0 }
 0x10d   : > { %v608_v10 = vadd.f32 %v4850_v25, %v607_v9  ;;  %4110 = vmatprep.mubr.msk.f32.mxu1 %vm799_vm2, %v4953_v5  ;;  %4136 = vmatprep.mubr.msk.f32.mxu0 %vm799_vm2, %v4953_v5 }
 0x10e   : > { %4111 = vmatmul.mubr.msk.f32.gmra.mrb[12].mxu1 %vm799_vm2, %v4955_v7  ;;  %4137 = vmatmul.mubr.msk.f32.gmra.mrb[26].mxu0 %vm799_vm2, %v4955_v7  ;;  %v4969_v13 = vmax.f32 %v613_v8, 0.0 }
 0x10f   : > { %v4967_v11 = vmax.f32 %v608_v10, 0.0  ;;  %v4085_v12 = vpop.f32.mrb[14].mxu0 }
 0x110   : > { %v623_v14 = vadd.f32 %v4085_v12, %v4850_v25  ;;  %v617_v15 = vpop.f32.mrb[15].mxu0  ;;  %v768_v48 = vrot.slane %v4969_v13, 1 }
 0x111   : > { %v618_v16 = vadd.f32 %v4850_v25, %v617_v15  ;;  %4113 = vmatprep.mubr.msk.f32.mxu1 %vm799_vm2, %v4967_v11  ;;  %4139 = vmatprep.mubr.msk.f32.mxu0 %vm799_vm2, %v4967_v11  ;;  %v3693_v25 = vld [vmem:[%s5806_s4 + $0x18] sm:$0xf]  ;;  %v767_v44 = vrot.slane %v4967_v11, 1 }
 0x112   : > { %4114 = vmatmul.mubr.msk.f32.gmra.mrb[14].mxu1 %vm799_vm2, %v4969_v13  ;;  %4140 = vmatmul.mubr.msk.f32.gmra.mrb[28].mxu0 %vm799_vm2, %v4969_v13  ;;  %v4983_v18 = vmax.f32 %v623_v14, 0.0  ;;  %v5106_v55 = vsel %vm748_vm3, %v768_v48, 0.0 }
 0x113   : > { %v4981_v17 = vmax.f32 %v618_v16, 0.0  ;;  %v5097_v50 = vsel %vm748_vm3, %v767_v44, %v768_v48 }
 0x114   : > { %v771_v54 = vrot.slane %v4983_v18, 1 }
 0x115   : > { %4116 = vmatprep.mubr.msk.f32.mxu1 %vm799_vm2, %v4981_v17  ;;  %4142 = vmatprep.mubr.msk.f32.mxu0 %vm799_vm2, %v4981_v17  ;;  %v770_v52 = vrot.slane %v4981_v17, 1 }
 0x116   : > { %4117 = vmatmul.mubr.msk.f32.gmra.mrb[16].mxu1 %vm799_vm2, %v4983_v18  ;;  %4143 = vmatmul.mubr.msk.f32.gmra.mrb[30].mxu0 %vm799_vm2, %v4983_v18  ;;  %v5120_v58 = vsel %vm748_vm3, %v771_v54, 0.0 }
 0x117   : > { %4147 = vmatprep.mubr.msk.f32.mxu0 %vm799_vm2, %v4889_v45  ;;  %4173 = vmatprep.mubr.msk.f32.mxu1 %vm799_vm2, %v4856_v31  ;;  %v5113_v56 = vsel %vm748_vm3, %v770_v52, %v771_v54 }
 0x11a   : > { %4148 = vmatmul.mubr.msk.f32.vlgmr.msra.gmra.mrb[16].mxu0 %vm799_vm2, %v5002_v21  ;;  %4174 = vmatmul.mubr.msk.f32.vlgmr.msra.gmra.mrb[18].mxu1 %vm799_vm2, %v4854_v30 }
 0x11b   : > { %4224 = vmatpush3.msk.msra.mxu0 %vm832_vm0, %v4869_v38  ;;  %4150 = vmatprep.mubr.msk.f32.mxu0 %vm799_vm2, %v5009_v22  ;;  %v764_v38 = vrot.slane %v4953_v5, 1 }
 0x11c   : > { %4176 = vmatprep.mubr.msk.f32.mxu1 %vm799_vm2, %v4883_v43  ;;  %4198 = vmatpush3.msk.msra.mxu1 %vm832_vm0, %v4874_v39  ;;  %v765_v39 = vrot.slane %v4955_v7, 1 }
 0x11d   : > { %4249 = vmatprep.subr.msk.mxu0 %vm832_vm0, %v3693_v25  ;;  %4327 = vmatprep.subr.msk.mxu1 %vm832_vm0, %v2443_v41 }
 0x11e   : > { %4151 = vmatmul.mubr.msk.f32.gmra.mrb[18].mxu0 %vm799_vm2, %v5025_v26  ;;  %4177 = vmatmul.mubr.msk.f32.gmra.mrb[20].mxu1 %vm799_vm2, %v4895_v47  ;;  %v5081_v42 = vsel %vm748_vm3, %v764_v38, %v765_v39  ;;  %v5090_v49 = vsel %vm748_vm3, %v765_v39, 0.0 }
 0x11f   : > { %4153 = vmatprep.mubr.msk.f32.mxu0 %vm799_vm2, %v5033_v27  ;;  %4179 = vmatprep.mubr.msk.f32.mxu1 %vm799_vm2, %v4911_v51 }
 0x122   : > { %4154 = vmatmul.mubr.msk.f32.gmra.mrb[20].mxu0 %vm799_vm2, %v5042_v32  ;;  %4180 = vmatmul.mubr.msk.f32.gmra.mrb[22].mxu1 %vm799_vm2, %v4913_v53 }
 0x123   : > { %4156 = vmatprep.mubr.msk.f32.mxu0 %vm799_vm2, %v5049_v33  ;;  %4182 = vmatprep.mubr.msk.f32.mxu1 %vm799_vm2, %v4925_v57 }
 0x126   : > { %4157 = vmatmul.mubr.msk.f32.gmra.mrb[22].mxu0 %vm799_vm2, %v5058_v36  ;;  %4183 = vmatmul.mubr.msk.f32.gmra.mrb[24].mxu1 %vm799_vm2, %v4927_v59 }
 0x127   : > { %4159 = vmatprep.mubr.msk.f32.mxu0 %vm799_vm2, %v5065_v37  ;;  %4185 = vmatprep.mubr.msk.f32.mxu1 %vm799_vm2, %v4939_v63 }
 0x12a   : > { %4160 = vmatmul.mubr.msk.f32.gmra.mrb[24].mxu0 %vm799_vm2, %v5074_v40  ;;  %4186 = vmatmul.mubr.msk.f32.gmra.mrb[26].mxu1 %vm799_vm2, %v4941_v1 }
 0x12b   : > { %4162 = vmatprep.mubr.msk.f32.mxu0 %vm799_vm2, %v5081_v42  ;;  %4188 = vmatprep.mubr.msk.f32.mxu1 %vm799_vm2, %v4953_v5 }
 0x12e   : > { %4163 = vmatmul.mubr.msk.f32.gmra.mrb[26].mxu0 %vm799_vm2, %v5090_v49  ;;  %4189 = vmatmul.mubr.msk.f32.gmra.mrb[28].mxu1 %vm799_vm2, %v4955_v7 }
 0x12f   : > { %4165 = vmatprep.mubr.msk.f32.mxu0 %vm799_vm2, %v5097_v50  ;;  %4191 = vmatprep.mubr.msk.f32.mxu1 %vm799_vm2, %v4967_v11 }
 0x132   : > { %4166 = vmatmul.mubr.msk.f32.gmra.mrb[28].mxu0 %vm799_vm2, %v5106_v55  ;;  %4192 = vmatmul.mubr.msk.f32.gmra.mrb[30].mxu1 %vm799_vm2, %v4969_v13 }
 0x133   : > { %4168 = vmatprep.mubr.msk.f32.mxu0 %vm799_vm2, %v5113_v56  ;;  %4194 = vmatprep.mubr.msk.f32.mxu1 %vm799_vm2, %v4981_v17 }
 0x136   : > { %4169 = vmatmul.mubr.msk.f32.gmra.mrb[30].mxu0 %vm799_vm2, %v5120_v58  ;;  %4195 = vmatmul.mubr.msk.f32.gmra.mrb[32].mxu1 %vm799_vm2, %v4983_v18 }
 0x137   : > { %4199 = vmatprep.mubr.msk.f32.mxu1 %vm799_vm2, %v4883_v43  ;;  %4225 = vmatprep.mubr.msk.f32.mxu0 %vm799_vm2, %v4856_v31  ;;  %v729_v31 = vstv %s728_s24  ;;  %s3814_s24 = sshll.u32 (%p4765_p5), %s4660_s30, 7 }
 0x138   : > { %v5188_v0 = vmul.f32 %v729_v31, %v726_v61  ;;  %s3169_s16 = sadd.s32 (%p4765_p5), %s3814_s24, %s3813_s27 }
 0x139   : > { %s3815_s25 = sshll.u32 (%p4765_p5), %s3169_s16, 3 }
 0x13a   : > { %4200 = vmatmul.mubr.msk.f32.vlgmr.msra.gmra.mrb[18].mxu1 %vm799_vm2, %v4895_v47  ;;  %4226 = vmatmul.mubr.msk.f32.vlgmr.msra.gmra.mrb[32].mxu0 %vm799_vm2, %v4854_v30  ;;  %v725_v30 = vmax.f32 %v4893_v46, 0.0  ;;  %v2257_v46 = vld [vmem:[%s5806_s4] sm:$0xf]  ;;  %s5660_s15 = scalar_lea.vmem (%p4765_p5), %s5810_s8, %s3815_s25 }
 0x13b   : > { %4250 = vmatpush3.msk.msra.mxu0 %vm832_vm0, %v3693_v25  ;;  %4202 = vmatprep.mubr.msk.f32.mxu1 %vm799_vm2, %v4911_v51 }
 0x13c   : > { %4228 = vmatprep.mubr.msk.f32.mxu0 %vm799_vm2, %v4883_v43  ;;  %4275 = vmatprep.subr.msk.mxu0 %vm832_vm0, %v3711_v60  ;;  %v5182_v62 = vmul.f32 %v729_v31, %v725_v30 }
 0x13d   : > { %4328 = vmatpush3.msk.msra.mxu1 %vm832_vm0, %v2443_v41 }
 0x13e   : > { %4203 = vmatmul.mubr.msk.f32.gmra.mrb[20].mxu1 %vm799_vm2, %v4913_v53  ;;  %4229 = vmatmul.mubr.msk.f32.gmra.mrb[34].mxu0 %vm799_vm2, %v4895_v47 }
 0x13f   : > { %4205 = vmatprep.mubr.msk.f32.mxu1 %vm799_vm2, %v4925_v57  ;;  %4231 = vmatprep.mubr.msk.f32.mxu0 %vm799_vm2, %v4911_v51 }
 0x142   : > { %4206 = vmatmul.mubr.msk.f32.gmra.mrb[22].mxu1 %vm799_vm2, %v4927_v59  ;;  %4232 = vmatmul.mubr.msk.f32.gmra.mrb[36].mxu0 %vm799_vm2, %v4913_v53 }
 0x143   : > { %4208 = vmatprep.mubr.msk.f32.mxu1 %vm799_vm2, %v4939_v63  ;;  %4234 = vmatprep.mubr.msk.f32.mxu0 %vm799_vm2, %v4925_v57 }
 0x146   : > { %4209 = vmatmul.mubr.msk.f32.gmra.mrb[24].mxu1 %vm799_vm2, %v4941_v1  ;;  %4235 = vmatmul.mubr.msk.f32.gmra.mrb[38].mxu0 %vm799_vm2, %v4927_v59 }
 0x147   : > { %4211 = vmatprep.mubr.msk.f32.mxu1 %vm799_vm2, %v4953_v5  ;;  %4237 = vmatprep.mubr.msk.f32.mxu0 %vm799_vm2, %v4939_v63 }
 0x14a   : > { %4212 = vmatmul.mubr.msk.f32.gmra.mrb[26].mxu1 %vm799_vm2, %v4955_v7  ;;  %4238 = vmatmul.mubr.msk.f32.gmra.mrb[40].mxu0 %vm799_vm2, %v4941_v1 }
 0x14b   : > { %4214 = vmatprep.mubr.msk.f32.mxu1 %vm799_vm2, %v4967_v11  ;;  %4240 = vmatprep.mubr.msk.f32.mxu0 %vm799_vm2, %v4953_v5 }
 0x14e   : > { %4215 = vmatmul.mubr.msk.f32.gmra.mrb[28].mxu1 %vm799_vm2, %v4969_v13  ;;  %4241 = vmatmul.mubr.msk.f32.gmra.mrb[42].mxu0 %vm799_vm2, %v4955_v7 }
 0x14f   : > { %4217 = vmatprep.mubr.msk.f32.mxu1 %vm799_vm2, %v4981_v17  ;;  %4243 = vmatprep.mubr.msk.f32.mxu0 %vm799_vm2, %v4967_v11 }
 0x152   : > { %4218 = vmatmul.mubr.msk.f32.gmra.mrb[30].mxu1 %vm799_vm2, %v4983_v18  ;;  %4244 = vmatmul.mubr.msk.f32.gmra.mrb[44].mxu0 %vm799_vm2, %v4969_v13 }
 0x153   : > { %4246 = vmatprep.mubr.msk.f32.mxu0 %vm799_vm2, %v4981_v17  ;;  %4220 = vmatprep.mubr.msk.f32.mxu1 %vm799_vm2, %v5182_v62 }
 0x156   : > { %4221 = vmatmul.mubr.msk.f32.gmra.mrb[32].mxu1 %vm799_vm2, %v5188_v0  ;;  %4247 = vmatmul.mubr.msk.f32.gmra.mrb[46].mxu0 %vm799_vm2, %v4983_v18 }
 0x157   : > { %4251 = vmatprep.mubr.msk.f32.mxu0 %vm799_vm2, %v4889_v45  ;;  %v791_v45 = vrot.slane %v5182_v62, 1 }
 0x15a   : > { %4252 = vmatmul.mubr.msk.f32.vlgmr.msra.gmra.mrb[32].mxu0 %vm799_vm2, %v5002_v21 }
 0x15b   : > { %4276 = vmatpush3.msk.msra.mxu0 %vm832_vm0, %v3711_v60  ;;  %4254 = vmatprep.mubr.msk.f32.mxu0 %vm799_vm2, %v5009_v22 }
 0x15c   : > { %4301 = vmatprep.subr.msk.mxu0 %vm832_vm0, %v2257_v46 }
 0x15e   : > { %4255 = vmatmul.mubr.msk.f32.gmra.mrb[34].mxu0 %vm799_vm2, %v5025_v26 }
 0x15f   : > { %4257 = vmatprep.mubr.msk.f32.mxu0 %vm799_vm2, %v5033_v27 }
 0x162   : > { %4258 = vmatmul.mubr.msk.f32.gmra.mrb[36].mxu0 %vm799_vm2, %v5042_v32 }
 0x163   : > { %4260 = vmatprep.mubr.msk.f32.mxu0 %vm799_vm2, %v5049_v33 }
 0x166   : > { %4261 = vmatmul.mubr.msk.f32.gmra.mrb[38].mxu0 %vm799_vm2, %v5058_v36 }
 0x167   : > { %4263 = vmatprep.mubr.msk.f32.mxu0 %vm799_vm2, %v5065_v37 }
 0x16a   : > { %4264 = vmatmul.mubr.msk.f32.gmra.mrb[40].mxu0 %vm799_vm2, %v5074_v40 }
 0x16b   : > { %4266 = vmatprep.mubr.msk.f32.mxu0 %vm799_vm2, %v5081_v42 }
 0x16e   : > { %4267 = vmatmul.mubr.msk.f32.gmra.mrb[42].mxu0 %vm799_vm2, %v5090_v49 }
 0x16f   : > { %4269 = vmatprep.mubr.msk.f32.mxu0 %vm799_vm2, %v5097_v50 }
 0x172   : > { %4270 = vmatmul.mubr.msk.f32.gmra.mrb[44].mxu0 %vm799_vm2, %v5106_v55 }
 0x173   : > { %4272 = vmatprep.mubr.msk.f32.mxu0 %vm799_vm2, %v5113_v56 }
 0x176   : > { %4273 = vmatmul.mubr.msk.f32.gmra.mrb[46].mxu0 %vm799_vm2, %v5120_v58 }
 0x177   : > { %4277 = vmatprep.mubr.msk.f32.mxu0 %vm799_vm2, %v4883_v43  ;;  %v792_v43 = vrot.slane %v5188_v0, 1 }
 0x17a   : > { %4278 = vmatmul.mubr.msk.f32.vlgmr.msra.gmra.mrb[32].mxu0 %vm799_vm2, %v4895_v47  ;;  %v793_v47 = vsel %vm748_vm3, %v791_v45, %v792_v43 }
 0x17b   : > { %4302 = vmatpush3.msk.msra.mxu0 %vm832_vm0, %v2257_v46  ;;  %4280 = vmatprep.mubr.msk.f32.mxu0 %vm799_vm2, %v4911_v51  ;;  %v795_v51 = vsel %vm748_vm3, %v792_v43, 0.0 }
 0x17e   : > { %4281 = vmatmul.mubr.msk.f32.gmra.mrb[34].mxu0 %vm799_vm2, %v4913_v53  ;;  %v5314_v53 = vld [vmem:[%s5807_s5] ss:$0 sm:$0xff] }
 0x17f   : > { %4283 = vmatprep.mubr.msk.f32.mxu0 %vm799_vm2, %v4925_v57 }
 0x182   : > { %4284 = vmatmul.mubr.msk.f32.gmra.mrb[36].mxu0 %vm799_vm2, %v4927_v59 }
 0x183   : > { %4286 = vmatprep.mubr.msk.f32.mxu0 %vm799_vm2, %v4939_v63 }
 0x186   : > { %4287 = vmatmul.mubr.msk.f32.gmra.mrb[38].mxu0 %vm799_vm2, %v4941_v1 }
 0x187   : > { %4289 = vmatprep.mubr.msk.f32.mxu0 %vm799_vm2, %v4953_v5 }
 0x18a   : > { %4290 = vmatmul.mubr.msk.f32.gmra.mrb[40].mxu0 %vm799_vm2, %v4955_v7 }
 0x18b   : > { %4292 = vmatprep.mubr.msk.f32.mxu0 %vm799_vm2, %v4967_v11 }
 0x18e   : > { %4293 = vmatmul.mubr.msk.f32.gmra.mrb[42].mxu0 %vm799_vm2, %v4969_v13 }
 0x18f   : > { %4295 = vmatprep.mubr.msk.f32.mxu0 %vm799_vm2, %v4981_v17 }
 0x192   : > { %4296 = vmatmul.mubr.msk.f32.gmra.mrb[44].mxu0 %vm799_vm2, %v4983_v18 }
 0x193   : > { %4298 = vmatprep.mubr.msk.f32.mxu0 %vm799_vm2, %v5182_v62 }
 0x196   : > { %4299 = vmatmul.mubr.msk.f32.gmra.mrb[46].mxu0 %vm799_vm2, %v5188_v0 }
 0x197   : > { %4303 = vmatprep.mubr.msk.f32.mxu0 %vm799_vm2, %v5009_v22 }
 0x19a   : > { %4304 = vmatmul.mubr.msk.f32.vlgmr.msra.gmra.mrb[32].mxu0 %vm799_vm2, %v5025_v26 }
 0x19b   : > { %4306 = vmatprep.mubr.msk.f32.mxu0 %vm799_vm2, %v5033_v27 }
 0x19e   : > { %4307 = vmatmul.mubr.msk.f32.gmra.mrb[34].mxu0 %vm799_vm2, %v5042_v32 }
 0x19f   : > { %4309 = vmatprep.mubr.msk.f32.mxu0 %vm799_vm2, %v5049_v33 }
 0x1a2   : > { %4310 = vmatmul.mubr.msk.f32.gmra.mrb[36].mxu0 %vm799_vm2, %v5058_v36 }
 0x1a3   : > { %4312 = vmatprep.mubr.msk.f32.mxu0 %vm799_vm2, %v5065_v37 }
 0x1a6   : > { %4313 = vmatmul.mubr.msk.f32.gmra.mrb[38].mxu0 %vm799_vm2, %v5074_v40 }
 0x1a7   : > { %4315 = vmatprep.mubr.msk.f32.mxu0 %vm799_vm2, %v5081_v42 }
 0x1aa   : > { %4316 = vmatmul.mubr.msk.f32.gmra.mrb[40].mxu0 %vm799_vm2, %v5090_v49 }
 0x1ab   : > { %4318 = vmatprep.mubr.msk.f32.mxu0 %vm799_vm2, %v5097_v50 }
 0x1ae   : > { %4319 = vmatmul.mubr.msk.f32.gmra.mrb[42].mxu0 %vm799_vm2, %v5106_v55 }
 0x1af   : > { %4321 = vmatprep.mubr.msk.f32.mxu0 %vm799_vm2, %v5113_v56 }
 0x1b2   : > { %4322 = vmatmul.mubr.msk.f32.gmra.mrb[44].mxu0 %vm799_vm2, %v5120_v58 }
 0x1b3   : > { %4324 = vmatprep.mubr.msk.f32.mxu0 %vm799_vm2, %v793_v47 }
 0x1b6   : > { %4325 = vmatmul.mubr.msk.f32.gmra.mrb[46].mxu0 %vm799_vm2, %v795_v51 }
 0x1cd   : > { %v4097_v57 = vpop.f32.mrb[2].mxu1 }
 0x1ce   : > { %v988_v59 = vadd.f32 %v4097_v57, %v5314_v53  ;;  %v902_v63 = vpop.f32.mrb[3].mxu1 }
 0x1cf   : > { %v987_v1 = vadd.f32 %v5314_v53, %v902_v63 }
 0x1d0   : > { %v1004_v4 = vmax.f32 %v988_v59, 0.0 }
 0x1d1   : > { %v1003_v2 = vmax.f32 %v987_v1, 0.0  ;;  %v4100_v3 = vpop.f32.mrb[4].mxu1 }
 0x1d2   : > { %v990_v5 = vadd.f32 %v4100_v3, %v5314_v53  ;;  %v912_v6 = vpop.f32.mrb[5].mxu1 }
 0x1d3   : > { %v989_v7 = vadd.f32 %v5314_v53, %v912_v6  ;;  %4329 = vmatprep.mubr.msk.f32.mxu1 %vm799_vm2, %v1003_v2 }
 0x1d4   : > { %4330 = vmatmul.mubr.msk.f32.vlgmr.msra.gmra.mrb[34].mxu1 %vm799_vm2, %v1004_v4  ;;  %v1006_v10 = vmax.f32 %v990_v5, 0.0 }
 0x1d5   : > { %v1005_v8 = vmax.f32 %v989_v7, 0.0  ;;  %v4103_v9 = vpop.f32.mrb[6].mxu1 }
 0x1d6   : > { %v992_v11 = vadd.f32 %v4103_v9, %v5314_v53  ;;  %v922_v12 = vpop.f32.mrb[7].mxu1 }
 0x1d7   : > { %v991_v13 = vadd.f32 %v5314_v53, %v922_v12  ;;  %4332 = vmatprep.mubr.msk.f32.mxu1 %vm799_vm2, %v1005_v8 }
 0x1d8   : > { %4333 = vmatmul.mubr.msk.f32.gmra.mrb[36].mxu1 %vm799_vm2, %v1006_v10  ;;  %v1008_v16 = vmax.f32 %v992_v11, 0.0 }
 0x1d9   : > { %v1007_v14 = vmax.f32 %v991_v13, 0.0  ;;  %v4106_v15 = vpop.f32.mrb[8].mxu1 }
 0x1da   : > { %v994_v17 = vadd.f32 %v4106_v15, %v5314_v53  ;;  %v932_v18 = vpop.f32.mrb[9].mxu1 }
 0x1db   : > { %v993_v19 = vadd.f32 %v5314_v53, %v932_v18  ;;  %4335 = vmatprep.mubr.msk.f32.mxu1 %vm799_vm2, %v1007_v14 }
 0x1dc   : > { %4336 = vmatmul.mubr.msk.f32.gmra.mrb[38].mxu1 %vm799_vm2, %v1008_v16  ;;  %v1010_v22 = vmax.f32 %v994_v17, 0.0 }
 0x1dd   : > { %v1009_v20 = vmax.f32 %v993_v19, 0.0  ;;  %v4109_v21 = vpop.f32.mrb[10].mxu1 }
 0x1de   : > { %v996_v23 = vadd.f32 %v4109_v21, %v5314_v53  ;;  %v942_v24 = vpop.f32.mrb[11].mxu1 }
 0x1df   : > { %v995_v25 = vadd.f32 %v5314_v53, %v942_v24  ;;  %4338 = vmatprep.mubr.msk.f32.mxu1 %vm799_vm2, %v1009_v20 }
 0x1e0   : > { %4339 = vmatmul.mubr.msk.f32.gmra.mrb[40].mxu1 %vm799_vm2, %v1010_v22  ;;  %v1012_v28 = vmax.f32 %v996_v23, 0.0 }
 0x1e1   : > { %v1011_v26 = vmax.f32 %v995_v25, 0.0  ;;  %v4112_v27 = vpop.f32.mrb[12].mxu1 }
 0x1e2   : > { %v998_v29 = vadd.f32 %v4112_v27, %v5314_v53  ;;  %v952_v32 = vpop.f32.mrb[13].mxu1 }
 0x1e3   : > { %v997_v33 = vadd.f32 %v5314_v53, %v952_v32  ;;  %4341 = vmatprep.mubr.msk.f32.mxu1 %vm799_vm2, %v1011_v26 }
 0x1e4   : > { %4342 = vmatmul.mubr.msk.f32.gmra.mrb[42].mxu1 %vm799_vm2, %v1012_v28  ;;  %v1014_v36 = vmax.f32 %v998_v29, 0.0 }
 0x1e5   : > { %v1013_v34 = vmax.f32 %v997_v33, 0.0  ;;  %v4115_v35 = vpop.f32.mrb[14].mxu1 }
 0x1e6   : > { %v1000_v37 = vadd.f32 %v4115_v35, %v5314_v53  ;;  %v962_v38 = vpop.f32.mrb[15].mxu1 }
 0x1e7   : > { %v999_v39 = vadd.f32 %v5314_v53, %v962_v38  ;;  %4344 = vmatprep.mubr.msk.f32.mxu1 %vm799_vm2, %v1013_v34 }
 0x1e8   : > { %4345 = vmatmul.mubr.msk.f32.gmra.mrb[44].mxu1 %vm799_vm2, %v1014_v36  ;;  %v1016_v44 = vmax.f32 %v1000_v37, 0.0 }
 0x1e9   : > { %v1015_v40 = vmax.f32 %v999_v39, 0.0  ;;  %v4118_v42 = vpop.f32.mrb[16].mxu1 }
 0x1ea   : > { %v1002_v48 = vadd.f32 %v4118_v42, %v5314_v53  ;;  %v972_v49 = vpop.f32.mrb[17].mxu1 }
 0x1eb   : > { %v1001_v50 = vadd.f32 %v5314_v53, %v972_v49  ;;  %4347 = vmatprep.mubr.msk.f32.mxu1 %vm799_vm2, %v1015_v40 }
 0x1ec   : > { %4348 = vmatmul.mubr.msk.f32.gmra.mrb[46].mxu1 %vm799_vm2, %v1016_v44  ;;  %v1018_v55 = vmax.f32 %v1002_v48, 0.0 }
 0x1ed   : > { %v1017_v52 = vmax.f32 %v1001_v50, 0.0  ;;  %v4149_v54 = vpop.f32.mrb[16].mxu0 }
 0x1ee   : > { %v4433_v56 = vadd.f32 %v4149_v54, %v5314_v53  ;;  %v1296_v58 = vpop.f32.mrb[17].mxu0 }
 0x1ef   : > { %v4434_v60 = vadd.f32 %v5314_v53, %v1296_v58  ;;  %4350 = vmatprep.mubr.msk.f32.mxu1 %vm799_vm2, %v1017_v52 }
 0x1f0   : > { %4351 = vmatmul.mubr.msk.f32.gmra.mrb[48].mxu1 %vm799_vm2, %v1018_v55  ;;  %v1392_v61 = vmax.f32 %v4433_v56, 0.0 }
 0x1f1   : > { %v1391_v30 = vmax.f32 %v4434_v60, 0.0  ;;  %v4152_v31 = vpop.f32.mrb[18].mxu0 }
 0x1f2   : > { %v4435_v62 = vadd.f32 %v4152_v31, %v5314_v53  ;;  %v1306_v0 = vpop.f32.mrb[19].mxu0 }
 0x1f3   : > { %v4436_v41 = vadd.f32 %v5314_v53, %v1306_v0  ;;  %4353 = vmatprep.mubr.msk.f32.mxu1 %vm799_vm2, %v1391_v30 }
 0x1f4   : > { %4354 = vmatmul.mubr.msk.f32.gmra.mrb[50].mxu1 %vm799_vm2, %v1392_v61  ;;  %v1394_v45 = vmax.f32 %v4435_v62, 0.0 }
 0x1f5   : > { %v1393_v46 = vmax.f32 %v4436_v41, 0.0  ;;  %v4155_v43 = vpop.f32.mrb[20].mxu0 }
 0x1f6   : > { %v4437_v47 = vadd.f32 %v4155_v43, %v5314_v53  ;;  %v1316_v51 = vpop.f32.mrb[21].mxu0 }
 0x1f7   : > { %v4438_v57 = vadd.f32 %v5314_v53, %v1316_v51  ;;  %4356 = vmatprep.mubr.msk.f32.mxu1 %vm799_vm2, %v1393_v46 }
 0x1f8   : > { %4357 = vmatmul.mubr.msk.f32.gmra.mrb[52].mxu1 %vm799_vm2, %v1394_v45  ;;  %v1396_v1 = vmax.f32 %v4437_v47, 0.0 }
 0x1f9   : > { %v1395_v59 = vmax.f32 %v4438_v57, 0.0  ;;  %v4158_v63 = vpop.f32.mrb[22].mxu0 }
 0x1fa   : > { %v4439_v2 = vadd.f32 %v4158_v63, %v5314_v53  ;;  %v1326_v3 = vpop.f32.mrb[23].mxu0 }
 0x1fb   : > { %v4440_v4 = vadd.f32 %v5314_v53, %v1326_v3  ;;  %4359 = vmatprep.mubr.msk.f32.mxu1 %vm799_vm2, %v1395_v59 }
 0x1fc   : > { %4360 = vmatmul.mubr.msk.f32.gmra.mrb[54].mxu1 %vm799_vm2, %v1396_v1  ;;  %v1398_v7 = vmax.f32 %v4439_v2, 0.0 }
 0x1fd   : > { %v1397_v5 = vmax.f32 %v4440_v4, 0.0  ;;  %v4161_v6 = vpop.f32.mrb[24].mxu0 }
 0x1fe   : > { %v4441_v8 = vadd.f32 %v4161_v6, %v5314_v53  ;;  %v1336_v9 = vpop.f32.mrb[25].mxu0 }
 0x1ff   : > { %v4442_v10 = vadd.f32 %v5314_v53, %v1336_v9  ;;  %4362 = vmatprep.mubr.msk.f32.mxu1 %vm799_vm2, %v1397_v5 }
 0x200   : > { %4363 = vmatmul.mubr.msk.f32.gmra.mrb[56].mxu1 %vm799_vm2, %v1398_v7  ;;  %v1400_v13 = vmax.f32 %v4441_v8, 0.0 }
 0x201   : > { %v1399_v11 = vmax.f32 %v4442_v10, 0.0  ;;  %v4164_v12 = vpop.f32.mrb[26].mxu0 }
 0x202   : > { %v4443_v14 = vadd.f32 %v4164_v12, %v5314_v53  ;;  %v1346_v15 = vpop.f32.mrb[27].mxu0 }
 0x203   : > { %v4444_v16 = vadd.f32 %v5314_v53, %v1346_v15  ;;  %4365 = vmatprep.mubr.msk.f32.mxu1 %vm799_vm2, %v1399_v11 }
 0x204   : > { %4366 = vmatmul.mubr.msk.f32.gmra.mrb[58].mxu1 %vm799_vm2, %v1400_v13  ;;  %v1402_v19 = vmax.f32 %v4443_v14, 0.0 }
 0x205   : > { %v1401_v17 = vmax.f32 %v4444_v16, 0.0  ;;  %v4167_v18 = vpop.f32.mrb[28].mxu0 }
 0x206   : > { %v4445_v20 = vadd.f32 %v4167_v18, %v5314_v53  ;;  %v1356_v21 = vpop.f32.mrb[29].mxu0 }
 0x207   : > { %v4446_v22 = vadd.f32 %v5314_v53, %v1356_v21  ;;  %4368 = vmatprep.mubr.msk.f32.mxu1 %vm799_vm2, %v1401_v17 }
 0x208   : > { %4369 = vmatmul.mubr.msk.f32.gmra.mrb[60].mxu1 %vm799_vm2, %v1402_v19  ;;  %v1404_v25 = vmax.f32 %v4445_v20, 0.0 }
 0x209   : > { %v1403_v23 = vmax.f32 %v4446_v22, 0.0  ;;  %v4170_v24 = vpop.f32.mrb[30].mxu0 }
 0x20a   : > { %v4447_v26 = vadd.f32 %v4170_v24, %v5314_v53  ;;  %v1366_v27 = vpop.f32.mrb[31].mxu0 }
 0x20b   : > { %v4448_v28 = vadd.f32 %v5314_v53, %v1366_v27  ;;  %4371 = vmatprep.mubr.msk.f32.mxu1 %vm799_vm2, %v1403_v23 }
 0x20c   : > { %4372 = vmatmul.mubr.msk.f32.gmra.mrb[62].mxu1 %vm799_vm2, %v1404_v25  ;;  %v1406_v33 = vmax.f32 %v4447_v26, 0.0 }
 0x20d   : > { %v1405_v29 = vmax.f32 %v4448_v28, 0.0  ;;  %v4201_v32 = vpop.f32.mrb[18].mxu1 }
 0x20e   : > { %v4449_v34 = vadd.f32 %v4201_v32, %v5314_v53  ;;  %v1648_v35 = vpop.f32.mrb[19].mxu1 }
 0x20f   : > { %v4450_v36 = vadd.f32 %v5314_v53, %v1648_v35  ;;  %4374 = vmatprep.mubr.msk.f32.mxu1 %vm799_vm2, %v1405_v29 }
 0x210   : > { %4375 = vmatmul.mubr.msk.f32.gmra.mrb[64].mxu1 %vm799_vm2, %v1406_v33  ;;  %v1744_v39 = vmax.f32 %v4449_v34, 0.0 }
 0x211   : > { %v1743_v37 = vmax.f32 %v4450_v36, 0.0  ;;  %v4204_v38 = vpop.f32.mrb[20].mxu1 }
 0x212   : > { %v4451_v40 = vadd.f32 %v4204_v38, %v5314_v53  ;;  %v1658_v42 = vpop.f32.mrb[21].mxu1 }
 0x213   : > { %v4452_v44 = vadd.f32 %v5314_v53, %v1658_v42  ;;  %4377 = vmatprep.mubr.msk.f32.mxu1 %vm799_vm2, %v1743_v37 }
 0x214   : > { %4378 = vmatmul.mubr.msk.f32.gmra.mrb[66].mxu1 %vm799_vm2, %v1744_v39  ;;  %v1746_v50 = vmax.f32 %v4451_v40, 0.0 }
 0x215   : > { %v1745_v48 = vmax.f32 %v4452_v44, 0.0  ;;  %v4207_v49 = vpop.f32.mrb[22].mxu1 }
 0x216   : > { %v4453_v52 = vadd.f32 %v4207_v49, %v5314_v53  ;;  %v1668_v54 = vpop.f32.mrb[23].mxu1 }
 0x217   : > { %v4454_v55 = vadd.f32 %v5314_v53, %v1668_v54  ;;  %4380 = vmatprep.mubr.msk.f32.mxu1 %vm799_vm2, %v1745_v48 }
 0x218   : > { %4381 = vmatmul.mubr.msk.f32.gmra.mrb[68].mxu1 %vm799_vm2, %v1746_v50  ;;  %v1748_v60 = vmax.f32 %v4453_v52, 0.0 }
 0x219   : > { %v1747_v56 = vmax.f32 %v4454_v55, 0.0  ;;  %v4210_v58 = vpop.f32.mrb[24].mxu1 }
 0x21a   : > { %v4455_v30 = vadd.f32 %v4210_v58, %v5314_v53  ;;  %v1678_v31 = vpop.f32.mrb[25].mxu1 }
 0x21b   : > { %v4456_v61 = vadd.f32 %v5314_v53, %v1678_v31  ;;  %4383 = vmatprep.mubr.msk.f32.mxu1 %vm799_vm2, %v1747_v56 }
 0x21c   : > { %4384 = vmatmul.mubr.msk.f32.gmra.mrb[70].mxu1 %vm799_vm2, %v1748_v60  ;;  %v1750_v41 = vmax.f32 %v4455_v30, 0.0 }
 0x21d   : > { %v1749_v62 = vmax.f32 %v4456_v61, 0.0  ;;  %v4213_v0 = vpop.f32.mrb[26].mxu1 }
 0x21e   : > { %v4457_v46 = vadd.f32 %v4213_v0, %v5314_v53  ;;  %v1688_v43 = vpop.f32.mrb[27].mxu1 }
 0x21f   : > { %v4458_v45 = vadd.f32 %v5314_v53, %v1688_v43  ;;  %4386 = vmatprep.mubr.msk.f32.mxu1 %vm799_vm2, %v1749_v62 }
 0x220   : > { %4387 = vmatmul.mubr.msk.f32.gmra.mrb[72].mxu1 %vm799_vm2, %v1750_v41  ;;  %v1752_v57 = vmax.f32 %v4457_v46, 0.0 }
 0x221   : > { %v1751_v47 = vmax.f32 %v4458_v45, 0.0  ;;  %v4216_v51 = vpop.f32.mrb[28].mxu1 }
 0x222   : > { %v4459_v59 = vadd.f32 %v4216_v51, %v5314_v53  ;;  %v1698_v63 = vpop.f32.mrb[29].mxu1 }
 0x223   : > { %v4460_v1 = vadd.f32 %v5314_v53, %v1698_v63  ;;  %4389 = vmatprep.mubr.msk.f32.mxu1 %vm799_vm2, %v1751_v47 }
 0x224   : > { %4390 = vmatmul.mubr.msk.f32.gmra.mrb[74].mxu1 %vm799_vm2, %v1752_v57  ;;  %v1754_v4 = vmax.f32 %v4459_v59, 0.0 }
 0x225   : > { %v1753_v2 = vmax.f32 %v4460_v1, 0.0  ;;  %v4219_v3 = vpop.f32.mrb[30].mxu1  ;;  %v5448_v1 = vld [vmem:[%s5809_s7] ss:$0 sm:$0xff] }
 0x226   : > { %v4461_v5 = vadd.f32 %v4219_v3, %v5314_v53  ;;  %v1708_v6 = vpop.f32.mrb[31].mxu1 }
 0x227   : > { %v4462_v7 = vadd.f32 %v5314_v53, %v1708_v6  ;;  %4392 = vmatprep.mubr.msk.f32.mxu1 %vm799_vm2, %v1753_v2 }
 0x228   : > { %4393 = vmatmul.mubr.msk.f32.gmra.mrb[76].mxu1 %vm799_vm2, %v1754_v4  ;;  %v1756_v10 = vmax.f32 %v4461_v5, 0.0 }
 0x229   : > { %v1755_v8 = vmax.f32 %v4462_v7, 0.0  ;;  %v4222_v9 = vpop.f32.mrb[32].mxu1 }
 0x22a   : > { %v4463_v11 = vadd.f32 %v4222_v9, %v5314_v53  ;;  %v1718_v12 = vpop.f32.mrb[33].mxu1 }
 0x22b   : > { %v4464_v13 = vadd.f32 %v5314_v53, %v1718_v12  ;;  %4395 = vmatprep.mubr.msk.f32.mxu1 %vm799_vm2, %v1755_v8 }
 0x22c   : > { %4396 = vmatmul.mubr.msk.f32.gmra.mrb[78].mxu1 %vm799_vm2, %v1756_v10  ;;  %v1758_v15 = vmax.f32 %v4463_v11, 0.0 }
 0x22d   : > { %v1757_v14 = vmax.f32 %v4464_v13, 0.0 }
 0x22f   : > { %4398 = vmatprep.mubr.msk.f32.mxu1 %vm799_vm2, %v1757_v14 }
 0x230   : > { %4399 = vmatmul.mubr.msk.f32.gmra.mrb[80].mxu1 %vm799_vm2, %v1758_v15 }
 0x26d   : > { %v4305_v16 = vpop.f32.mrb[32].mxu0 }
 0x26e   : > { %v4465_v17 = vadd.f32 %v4305_v16, %v5314_v53  ;;  %v2332_v18 = vpop.f32.mrb[33].mxu0 }
 0x26f   : > { %v4466_v19 = vadd.f32 %v5314_v53, %v2332_v18 }
 0x270   : > { %v2428_v22 = vmax.f32 %v4465_v17, 0.0 }
 0x271   : > { %v2427_v20 = vmax.f32 %v4466_v19, 0.0  ;;  %v4308_v21 = vpop.f32.mrb[34].mxu0 }
 0x272   : > { %v4467_v23 = vadd.f32 %v4308_v21, %v5314_v53  ;;  %v2342_v24 = vpop.f32.mrb[35].mxu0 }
 0x273   : > { %v4468_v25 = vadd.f32 %v5314_v53, %v2342_v24  ;;  %4401 = vmatprep.mubr.msk.f32.mxu1 %vm799_vm2, %v2427_v20 }
 0x274   : > { %4402 = vmatmul.mubr.msk.f32.gmra.mrb[82].mxu1 %vm799_vm2, %v2428_v22  ;;  %v2430_v28 = vmax.f32 %v4467_v23, 0.0 }
 0x275   : > { %v2429_v26 = vmax.f32 %v4468_v25, 0.0  ;;  %v4311_v27 = vpop.f32.mrb[36].mxu0 }
 0x276   : > { %v4469_v29 = vadd.f32 %v4311_v27, %v5314_v53  ;;  %v2352_v32 = vpop.f32.mrb[37].mxu0 }
 0x277   : > { %v4470_v33 = vadd.f32 %v5314_v53, %v2352_v32  ;;  %4404 = vmatprep.mubr.msk.f32.mxu1 %vm799_vm2, %v2429_v26 }
 0x278   : > { %4405 = vmatmul.mubr.msk.f32.gmra.mrb[84].mxu1 %vm799_vm2, %v2430_v28  ;;  %v2432_v36 = vmax.f32 %v4469_v29, 0.0 }
 0x279   : > { %v2431_v34 = vmax.f32 %v4470_v33, 0.0  ;;  %v4314_v35 = vpop.f32.mrb[38].mxu0 }
 0x27a   : > { %v4471_v37 = vadd.f32 %v4314_v35, %v5314_v53  ;;  %v2362_v38 = vpop.f32.mrb[39].mxu0 }
 0x27b   : > { %v4472_v39 = vadd.f32 %v5314_v53, %v2362_v38  ;;  %4407 = vmatprep.mubr.msk.f32.mxu1 %vm799_vm2, %v2431_v34 }
 0x27c   : > { %4408 = vmatmul.mubr.msk.f32.gmra.mrb[86].mxu1 %vm799_vm2, %v2432_v36  ;;  %v2434_v44 = vmax.f32 %v4471_v37, 0.0 }
 0x27d   : > { %v2433_v40 = vmax.f32 %v4472_v39, 0.0  ;;  %v4317_v42 = vpop.f32.mrb[40].mxu0 }
 0x27e   : > { %v4473_v48 = vadd.f32 %v4317_v42, %v5314_v53  ;;  %v2372_v49 = vpop.f32.mrb[41].mxu0 }
 0x27f   : > { %v4474_v50 = vadd.f32 %v5314_v53, %v2372_v49  ;;  %4410 = vmatprep.mubr.msk.f32.mxu1 %vm799_vm2, %v2433_v40 }
 0x280   : > { %4411 = vmatmul.mubr.msk.f32.gmra.mrb[88].mxu1 %vm799_vm2, %v2434_v44  ;;  %v2436_v55 = vmax.f32 %v4473_v48, 0.0 }
 0x281   : > { %v2435_v52 = vmax.f32 %v4474_v50, 0.0  ;;  %v4320_v54 = vpop.f32.mrb[42].mxu0 }
 0x282   : > { %v4475_v56 = vadd.f32 %v4320_v54, %v5314_v53  ;;  %v2382_v58 = vpop.f32.mrb[43].mxu0 }
 0x283   : > { %v4476_v60 = vadd.f32 %v5314_v53, %v2382_v58  ;;  %4413 = vmatprep.mubr.msk.f32.mxu1 %vm799_vm2, %v2435_v52 }
 0x284   : > { %4414 = vmatmul.mubr.msk.f32.gmra.mrb[90].mxu1 %vm799_vm2, %v2436_v55  ;;  %v2438_v61 = vmax.f32 %v4475_v56, 0.0 }
 0x285   : > { %v2437_v30 = vmax.f32 %v4476_v60, 0.0  ;;  %v4323_v31 = vpop.f32.mrb[44].mxu0 }
 0x286   : > { %v4477_v62 = vadd.f32 %v4323_v31, %v5314_v53  ;;  %v2392_v0 = vpop.f32.mrb[45].mxu0 }
 0x287   : > { %v4478_v41 = vadd.f32 %v5314_v53, %v2392_v0  ;;  %4416 = vmatprep.mubr.msk.f32.mxu1 %vm799_vm2, %v2437_v30 }
 0x288   : > { %4417 = vmatmul.mubr.msk.f32.gmra.mrb[92].mxu1 %vm799_vm2, %v2438_v61  ;;  %v2440_v45 = vmax.f32 %v4477_v62, 0.0 }
 0x289   : > { %v2439_v46 = vmax.f32 %v4478_v41, 0.0  ;;  %v4326_v43 = vpop.f32.mrb[46].mxu0 }
 0x28a   : > { %v4479_v47 = vadd.f32 %v4326_v43, %v5314_v53  ;;  %v2402_v51 = vpop.f32.mrb[47].mxu0 }
 0x28b   : > { %v4480_v57 = vadd.f32 %v5314_v53, %v2402_v51  ;;  %4419 = vmatprep.mubr.msk.f32.mxu1 %vm799_vm2, %v2439_v46 }
 0x28c   : > { %4420 = vmatmul.mubr.msk.f32.gmra.mrb[94].mxu1 %vm799_vm2, %v2440_v45  ;;  %v2442_v63 = vmax.f32 %v4479_v47, 0.0 }
 0x28d   : > { %v2441_v59 = vmax.f32 %v4480_v57, 0.0 }
 0x28f   : > { %4422 = vmatprep.mubr.msk.f32.mxu1 %vm799_vm2, %v2441_v59 }
 0x290   : > { %4423 = vmatmul.mubr.msk.f32.gmra.mrb[96].mxu1 %vm799_vm2, %v2442_v63 }
 0x2a7   : > { %v4331_v2 = vpop.f32.mrb[34].mxu1 }
 0x2a8   : > { %v2718_v53 = vadd.f32 %v4331_v2, %v5448_v1  ;;  %v2712_v3 = vpop.f32.mrb[35].mxu1 }
 0x2a9   : > { %v2713_v4 = vadd.f32 %v5448_v1, %v2712_v3 }
 0x2aa   : > { %v3032_v5 = vmax.f32 %v2718_v53, 0.0 }
 0x2ab   : > { %v3031_v6 = vmax.f32 %v2713_v4, 0.0  ;;  %v4334_v7 = vpop.f32.mrb[36].mxu1 }
 0x2ac   : > { %3097 = vst.msk [vmem:[%s5452_s23 + $0x8] sm:$0xff] %vm3095_vm4, %v3032_v5  ;;  %v2728_v8 = vadd.f32 %v4334_v7, %v5448_v1  ;;  %v2722_v9 = vpop.f32.mrb[37].mxu1 }
 0x2ad   : > { %3096 = vst.msk [vmem:[%s5452_s23] sm:$0xff] %vm3095_vm4, %v3031_v6  ;;  %v2723_v10 = vadd.f32 %v5448_v1, %v2722_v9 }
 0x2ae   : > { %v3034_v11 = vmax.f32 %v2728_v8, 0.0 }
 0x2af   : > { %v3033_v12 = vmax.f32 %v2723_v10, 0.0  ;;  %v4337_v13 = vpop.f32.mrb[38].mxu1 }
 0x2b0   : > { %3099 = vst.msk [vmem:[%s5452_s23 + $0x18] sm:$0xff] %vm3095_vm4, %v3034_v11  ;;  %v2738_v14 = vadd.f32 %v4337_v13, %v5448_v1  ;;  %v2732_v15 = vpop.f32.mrb[39].mxu1 }
 0x2b1   : > { %3098 = vst.msk [vmem:[%s5452_s23 + $0x10] sm:$0xff] %vm3095_vm4, %v3033_v12  ;;  %v2733_v16 = vadd.f32 %v5448_v1, %v2732_v15 }
 0x2b2   : > { %v3036_v17 = vmax.f32 %v2738_v14, 0.0 }
 0x2b3   : > { %v3035_v18 = vmax.f32 %v2733_v16, 0.0  ;;  %v4340_v19 = vpop.f32.mrb[40].mxu1 }
 0x2b4   : > { %3101 = vst.msk [vmem:[%s5452_s23 + $0x28] sm:$0xff] %vm3095_vm4, %v3036_v17  ;;  %v2748_v20 = vadd.f32 %v4340_v19, %v5448_v1  ;;  %v2742_v21 = vpop.f32.mrb[41].mxu1 }
 0x2b5   : > { %3100 = vst.msk [vmem:[%s5452_s23 + $0x20] sm:$0xff] %vm3095_vm4, %v3035_v18  ;;  %v2743_v22 = vadd.f32 %v5448_v1, %v2742_v21 }
 0x2b6   : > { %v3038_v23 = vmax.f32 %v2748_v20, 0.0 }
 0x2b7   : > { %v3037_v24 = vmax.f32 %v2743_v22, 0.0  ;;  %v4343_v25 = vpop.f32.mrb[42].mxu1 }
 0x2b8   : > { %3103 = vst.msk [vmem:[%s5452_s23 + $0x38] sm:$0xff] %vm3095_vm4, %v3038_v23  ;;  %v2758_v26 = vadd.f32 %v4343_v25, %v5448_v1  ;;  %v2752_v27 = vpop.f32.mrb[43].mxu1 }
 0x2b9   : > { %3102 = vst.msk [vmem:[%s5452_s23 + $0x30] sm:$0xff] %vm3095_vm4, %v3037_v24  ;;  %v2753_v28 = vadd.f32 %v5448_v1, %v2752_v27 }
 0x2ba   : > { %v3040_v29 = vmax.f32 %v2758_v26, 0.0 }
 0x2bb   : > { %v3039_v32 = vmax.f32 %v2753_v28, 0.0  ;;  %v4346_v33 = vpop.f32.mrb[44].mxu1 }
 0x2bc   : > { %3105 = vst.msk [vmem:[%s5452_s23 + $0x48] sm:$0xff] %vm3095_vm4, %v3040_v29  ;;  %v2768_v34 = vadd.f32 %v4346_v33, %v5448_v1  ;;  %v2762_v35 = vpop.f32.mrb[45].mxu1 }
 0x2bd   : > { %3104 = vst.msk [vmem:[%s5452_s23 + $0x40] sm:$0xff] %vm3095_vm4, %v3039_v32  ;;  %v2763_v36 = vadd.f32 %v5448_v1, %v2762_v35 }
 0x2be   : > { %v3042_v37 = vmax.f32 %v2768_v34, 0.0 }
 0x2bf   : > { %v3041_v38 = vmax.f32 %v2763_v36, 0.0  ;;  %v4349_v39 = vpop.f32.mrb[46].mxu1 }
 0x2c0   : > { %3107 = vst.msk [vmem:[%s5452_s23 + $0x58] sm:$0xff] %vm3095_vm4, %v3042_v37  ;;  %v2778_v40 = vadd.f32 %v4349_v39, %v5448_v1  ;;  %v2772_v42 = vpop.f32.mrb[47].mxu1 }
 0x2c1   : > { %3106 = vst.msk [vmem:[%s5452_s23 + $0x50] sm:$0xff] %vm3095_vm4, %v3041_v38  ;;  %v2773_v44 = vadd.f32 %v5448_v1, %v2772_v42 }
 0x2c2   : > { %v3044_v48 = vmax.f32 %v2778_v40, 0.0 }
 0x2c3   : > { %v3043_v49 = vmax.f32 %v2773_v44, 0.0  ;;  %v4352_v50 = vpop.f32.mrb[48].mxu1 }
 0x2c4   : > { %3109 = vst.msk [vmem:[%s5452_s23 + $0x68] sm:$0xff] %vm3095_vm4, %v3044_v48  ;;  %v2788_v52 = vadd.f32 %v4352_v50, %v5448_v1  ;;  %v2782_v54 = vpop.f32.mrb[49].mxu1 }
 0x2c5   : > { %3108 = vst.msk [vmem:[%s5452_s23 + $0x60] sm:$0xff] %vm3095_vm4, %v3043_v49  ;;  %v2783_v55 = vadd.f32 %v5448_v1, %v2782_v54 }
 0x2c6   : > { %v3046_v56 = vmax.f32 %v2788_v52, 0.0 }
 0x2c7   : > { %v3045_v58 = vmax.f32 %v2783_v55, 0.0  ;;  %v4355_v60 = vpop.f32.mrb[50].mxu1 }
 0x2c8   : > { %3111 = vst.msk [vmem:[%s5452_s23 + $0x78] sm:$0xff] %vm3095_vm4, %v3046_v56  ;;  %v2798_v30 = vadd.f32 %v4355_v60, %v5448_v1  ;;  %v2792_v31 = vpop.f32.mrb[51].mxu1 }
 0x2c9   : > { %3110 = vst.msk [vmem:[%s5452_s23 + $0x70] sm:$0xff] %vm3095_vm4, %v3045_v58  ;;  %v2793_v61 = vadd.f32 %v5448_v1, %v2792_v31 }
 0x2ca   : > { %v3048_v62 = vmax.f32 %v2798_v30, 0.0 }
 0x2cb   : > { %v3047_v0 = vmax.f32 %v2793_v61, 0.0  ;;  %v4358_v41 = vpop.f32.mrb[52].mxu1 }
 0x2cc   : > { %3113 = vst.msk [vmem:[%s5452_s23 + $0x88] sm:$0xff] %vm3095_vm4, %v3048_v62  ;;  %v2808_v46 = vadd.f32 %v4358_v41, %v5448_v1  ;;  %v2802_v43 = vpop.f32.mrb[53].mxu1 }
 0x2cd   : > { %3112 = vst.msk [vmem:[%s5452_s23 + $0x80] sm:$0xff] %vm3095_vm4, %v3047_v0  ;;  %v2803_v45 = vadd.f32 %v5448_v1, %v2802_v43 }
 0x2ce   : > { %v3050_v47 = vmax.f32 %v2808_v46, 0.0 }
 0x2cf   : > { %v3049_v51 = vmax.f32 %v2803_v45, 0.0  ;;  %v4361_v57 = vpop.f32.mrb[54].mxu1 }
 0x2d0   : > { %3115 = vst.msk [vmem:[%s5452_s23 + $0x98] sm:$0xff] %vm3095_vm4, %v3050_v47  ;;  %v2818_v59 = vadd.f32 %v4361_v57, %v5448_v1  ;;  %v2812_v63 = vpop.f32.mrb[55].mxu1 }
 0x2d1   : > { %3114 = vst.msk [vmem:[%s5452_s23 + $0x90] sm:$0xff] %vm3095_vm4, %v3049_v51  ;;  %v2813_v2 = vadd.f32 %v5448_v1, %v2812_v63 }
 0x2d2   : > { %v3052_v53 = vmax.f32 %v2818_v59, 0.0 }
 0x2d3   : > { %v3051_v3 = vmax.f32 %v2813_v2, 0.0  ;;  %v4364_v4 = vpop.f32.mrb[56].mxu1 }
 0x2d4   : > { %3117 = vst.msk [vmem:[%s5452_s23 + $0xa8] sm:$0xff] %vm3095_vm4, %v3052_v53  ;;  %v2828_v5 = vadd.f32 %v4364_v4, %v5448_v1  ;;  %v2822_v6 = vpop.f32.mrb[57].mxu1 }
 0x2d5   : > { %3116 = vst.msk [vmem:[%s5452_s23 + $0xa0] sm:$0xff] %vm3095_vm4, %v3051_v3  ;;  %v2823_v7 = vadd.f32 %v5448_v1, %v2822_v6 }
 0x2d6   : > { %v3054_v8 = vmax.f32 %v2828_v5, 0.0 }
 0x2d7   : > { %v3053_v9 = vmax.f32 %v2823_v7, 0.0  ;;  %v4367_v10 = vpop.f32.mrb[58].mxu1 }
 0x2d8   : > { %3119 = vst.msk [vmem:[%s5452_s23 + $0xb8] sm:$0xff] %vm3095_vm4, %v3054_v8  ;;  %v2838_v11 = vadd.f32 %v4367_v10, %v5448_v1  ;;  %v2832_v12 = vpop.f32.mrb[59].mxu1 }
 0x2d9   : > { %3118 = vst.msk [vmem:[%s5452_s23 + $0xb0] sm:$0xff] %vm3095_vm4, %v3053_v9  ;;  %v2833_v13 = vadd.f32 %v5448_v1, %v2832_v12 }
 0x2da   : > { %v3056_v14 = vmax.f32 %v2838_v11, 0.0 }
 0x2db   : > { %v3055_v15 = vmax.f32 %v2833_v13, 0.0  ;;  %v4370_v16 = vpop.f32.mrb[60].mxu1 }
 0x2dc   : > { %3121 = vst.msk [vmem:[%s5452_s23 + $0xc8] sm:$0xff] %vm3095_vm4, %v3056_v14  ;;  %v2848_v17 = vadd.f32 %v4370_v16, %v5448_v1  ;;  %v2842_v18 = vpop.f32.mrb[61].mxu1 }
 0x2dd   : > { %3120 = vst.msk [vmem:[%s5452_s23 + $0xc0] sm:$0xff] %vm3095_vm4, %v3055_v15  ;;  %v2843_v19 = vadd.f32 %v5448_v1, %v2842_v18 }
 0x2de   : > { %v3058_v20 = vmax.f32 %v2848_v17, 0.0 }
 0x2df   : > { %v3057_v21 = vmax.f32 %v2843_v19, 0.0  ;;  %v4373_v22 = vpop.f32.mrb[62].mxu1 }
 0x2e0   : > { %3123 = vst.msk [vmem:[%s5452_s23 + $0xd8] sm:$0xff] %vm3095_vm4, %v3058_v20  ;;  %v2858_v23 = vadd.f32 %v4373_v22, %v5448_v1  ;;  %v2852_v24 = vpop.f32.mrb[63].mxu1 }
 0x2e1   : > { %3122 = vst.msk [vmem:[%s5452_s23 + $0xd0] sm:$0xff] %vm3095_vm4, %v3057_v21  ;;  %v2853_v25 = vadd.f32 %v5448_v1, %v2852_v24 }
 0x2e2   : > { %v3060_v26 = vmax.f32 %v2858_v23, 0.0 }
 0x2e3   : > { %v3059_v27 = vmax.f32 %v2853_v25, 0.0  ;;  %v4376_v28 = vpop.f32.mrb[64].mxu1 }
 0x2e4   : > { %3125 = vst.msk [vmem:[%s5452_s23 + $0xe8] sm:$0xff] %vm3095_vm4, %v3060_v26  ;;  %v2868_v29 = vadd.f32 %v4376_v28, %v5448_v1  ;;  %v2862_v32 = vpop.f32.mrb[65].mxu1 }
 0x2e5   : > { %3124 = vst.msk [vmem:[%s5452_s23 + $0xe0] sm:$0xff] %vm3095_vm4, %v3059_v27  ;;  %v2863_v33 = vadd.f32 %v5448_v1, %v2862_v32 }
 0x2e6   : > { %v3062_v34 = vmax.f32 %v2868_v29, 0.0 }
 0x2e7   : > { %v3061_v35 = vmax.f32 %v2863_v33, 0.0  ;;  %v4379_v36 = vpop.f32.mrb[66].mxu1 }
 0x2e8   : > { %3127 = vst.msk [vmem:[%s5452_s23 + $0xf8] sm:$0xff] %vm3095_vm4, %v3062_v34  ;;  %v2878_v37 = vadd.f32 %v4379_v36, %v5448_v1  ;;  %v2872_v38 = vpop.f32.mrb[67].mxu1 }
 0x2e9   : > { %3126 = vst.msk [vmem:[%s5452_s23 + $0xf0] sm:$0xff] %vm3095_vm4, %v3061_v35  ;;  %v2873_v39 = vadd.f32 %v5448_v1, %v2872_v38 }
 0x2ea   : > { %v3064_v40 = vmax.f32 %v2878_v37, 0.0 }
 0x2eb   : > { %v3063_v42 = vmax.f32 %v2873_v39, 0.0  ;;  %v4382_v44 = vpop.f32.mrb[68].mxu1 }
 0x2ec   : > { %3129 = vst.msk [vmem:[%s5452_s23 + $0x108] sm:$0xff] %vm3095_vm4, %v3064_v40  ;;  %v2888_v48 = vadd.f32 %v4382_v44, %v5448_v1  ;;  %v2882_v49 = vpop.f32.mrb[69].mxu1 }
 0x2ed   : > { %3128 = vst.msk [vmem:[%s5452_s23 + $0x100] sm:$0xff] %vm3095_vm4, %v3063_v42  ;;  %v2883_v50 = vadd.f32 %v5448_v1, %v2882_v49 }
 0x2ee   : > { %v3066_v52 = vmax.f32 %v2888_v48, 0.0 }
 0x2ef   : > { %v3065_v54 = vmax.f32 %v2883_v50, 0.0  ;;  %v4385_v55 = vpop.f32.mrb[70].mxu1 }
 0x2f0   : > { %3131 = vst.msk [vmem:[%s5452_s23 + $0x118] sm:$0xff] %vm3095_vm4, %v3066_v52  ;;  %v2898_v56 = vadd.f32 %v4385_v55, %v5448_v1  ;;  %v2892_v58 = vpop.f32.mrb[71].mxu1 }
 0x2f1   : > { %3130 = vst.msk [vmem:[%s5452_s23 + $0x110] sm:$0xff] %vm3095_vm4, %v3065_v54  ;;  %v2893_v60 = vadd.f32 %v5448_v1, %v2892_v58 }
 0x2f2   : > { %v3068_v30 = vmax.f32 %v2898_v56, 0.0 }
 0x2f3   : > { %v3067_v31 = vmax.f32 %v2893_v60, 0.0  ;;  %v4388_v61 = vpop.f32.mrb[72].mxu1 }
 0x2f4   : > { %3133 = vst.msk [vmem:[%s5452_s23 + $0x128] sm:$0xff] %vm3095_vm4, %v3068_v30  ;;  %v2908_v62 = vadd.f32 %v4388_v61, %v5448_v1  ;;  %v2902_v0 = vpop.f32.mrb[73].mxu1 }
 0x2f5   : > { %3132 = vst.msk [vmem:[%s5452_s23 + $0x120] sm:$0xff] %vm3095_vm4, %v3067_v31  ;;  %v2903_v41 = vadd.f32 %v5448_v1, %v2902_v0 }
 0x2f6   : > { %v3070_v46 = vmax.f32 %v2908_v62, 0.0 }
 0x2f7   : > { %v3069_v43 = vmax.f32 %v2903_v41, 0.0  ;;  %v4391_v45 = vpop.f32.mrb[74].mxu1 }
 0x2f8   : > { %3135 = vst.msk [vmem:[%s5452_s23 + $0x138] sm:$0xff] %vm3095_vm4, %v3070_v46  ;;  %v2918_v47 = vadd.f32 %v4391_v45, %v5448_v1  ;;  %v2912_v51 = vpop.f32.mrb[75].mxu1 }
 0x2f9   : > { %3134 = vst.msk [vmem:[%s5452_s23 + $0x130] sm:$0xff] %vm3095_vm4, %v3069_v43  ;;  %v2913_v57 = vadd.f32 %v5448_v1, %v2912_v51 }
 0x2fa   : > { %v3072_v59 = vmax.f32 %v2918_v47, 0.0 }
 0x2fb   : > { %v3071_v63 = vmax.f32 %v2913_v57, 0.0  ;;  %v4394_v2 = vpop.f32.mrb[76].mxu1 }
 0x2fc   : > { %3137 = vst.msk [vmem:[%s5452_s23 + $0x148] sm:$0xff] %vm3095_vm4, %v3072_v59  ;;  %v2928_v53 = vadd.f32 %v4394_v2, %v5448_v1  ;;  %v2922_v3 = vpop.f32.mrb[77].mxu1 }
 0x2fd   : > { %3136 = vst.msk [vmem:[%s5452_s23 + $0x140] sm:$0xff] %vm3095_vm4, %v3071_v63  ;;  %v2923_v4 = vadd.f32 %v5448_v1, %v2922_v3 }
 0x2fe   : > { %v3074_v5 = vmax.f32 %v2928_v53, 0.0 }
 0x2ff   : > { %v3073_v6 = vmax.f32 %v2923_v4, 0.0  ;;  %v4397_v7 = vpop.f32.mrb[78].mxu1  ;;  %v3327_v4 = vld [vmem:[%s5452_s23 + $0x8] sm:$0xff] (%p4765_p5) }
 0x300   : > { %3139 = vst.msk [vmem:[%s5452_s23 + $0x158] sm:$0xff] %vm3095_vm4, %v3074_v5  ;;  %v2938_v8 = vadd.f32 %v4397_v7, %v5448_v1  ;;  %v2932_v9 = vpop.f32.mrb[79].mxu1  ;;  %v3329_v5 = vld [vmem:[%s5452_s23 + $0x10] sm:$0xff] (%p4765_p5)  ;;  %v3333_v7 = vld [vmem:[%s5452_s23 + $0x20] sm:$0xff] (%p4765_p5)  ;;  %3328 = vst [vmem:[%s5660_s15 + $0x8] sm:$0xff] (%p4765_p5), %v3327_v4 }
 0x301   : > { %3138 = vst.msk [vmem:[%s5452_s23 + $0x150] sm:$0xff] %vm3095_vm4, %v3073_v6  ;;  %v2933_v10 = vadd.f32 %v5448_v1, %v2932_v9  ;;  %v3331_v6 = vld [vmem:[%s5452_s23 + $0x18] sm:$0xff] (%p4765_p5)  ;;  %v3337_v9 = vld [vmem:[%s5452_s23 + $0x30] sm:$0xff] (%p4765_p5)  ;;  %3330 = vst [vmem:[%s5660_s15 + $0x10] sm:$0xff] (%p4765_p5), %v3329_v5 }
 0x302   : > { %v3076_v11 = vmax.f32 %v2938_v8, 0.0  ;;  %v3335_v8 = vld [vmem:[%s5452_s23 + $0x28] sm:$0xff] (%p4765_p5)  ;;  %3332 = vst [vmem:[%s5660_s15 + $0x18] sm:$0xff] (%p4765_p5), %v3331_v6  ;;  %3334 = vst [vmem:[%s5660_s15 + $0x20] sm:$0xff] (%p4765_p5), %v3333_v7 }
 0x303   : > { %v3075_v12 = vmax.f32 %v2933_v10, 0.0  ;;  %v4400_v13 = vpop.f32.mrb[80].mxu1  ;;  %v3339_v10 = vld [vmem:[%s5452_s23 + $0x38] sm:$0xff] (%p4765_p5)  ;;  %3336 = vst [vmem:[%s5660_s15 + $0x28] sm:$0xff] (%p4765_p5), %v3335_v8  ;;  %3338 = vst [vmem:[%s5660_s15 + $0x30] sm:$0xff] (%p4765_p5), %v3337_v9 }
 0x304   : > { %3141 = vst.msk [vmem:[%s5452_s23 + $0x168] sm:$0xff] %vm3095_vm4, %v3076_v11  ;;  %v2948_v14 = vadd.f32 %v4400_v13, %v5448_v1  ;;  %v2942_v15 = vpop.f32.mrb[81].mxu1  ;;  %v3341_v11 = vld [vmem:[%s5452_s23 + $0x40] sm:$0xff] (%p4765_p5)  ;;  %v3345_v13 = vld [vmem:[%s5452_s23 + $0x50] sm:$0xff] (%p4765_p5)  ;;  %3340 = vst [vmem:[%s5660_s15 + $0x38] sm:$0xff] (%p4765_p5), %v3339_v10 }
 0x305   : > { %3140 = vst.msk [vmem:[%s5452_s23 + $0x160] sm:$0xff] %vm3095_vm4, %v3075_v12  ;;  %v2943_v16 = vadd.f32 %v5448_v1, %v2942_v15  ;;  %v3343_v12 = vld [vmem:[%s5452_s23 + $0x48] sm:$0xff] (%p4765_p5)  ;;  %3342 = vst [vmem:[%s5660_s15 + $0x40] sm:$0xff] (%p4765_p5), %v3341_v11  ;;  %v3349_v15 = vld [vmem:[%s5452_s23 + $0x60] sm:$0xff] (%p4765_p5) }
 0x306   : > { %v3078_v17 = vmax.f32 %v2948_v14, 0.0  ;;  %v3347_v14 = vld [vmem:[%s5452_s23 + $0x58] sm:$0xff] (%p4765_p5)  ;;  %3344 = vst [vmem:[%s5660_s15 + $0x48] sm:$0xff] (%p4765_p5), %v3343_v12  ;;  %3346 = vst [vmem:[%s5660_s15 + $0x50] sm:$0xff] (%p4765_p5), %v3345_v13 }
 0x307   : > { %v3077_v18 = vmax.f32 %v2943_v16, 0.0  ;;  %3348 = vst [vmem:[%s5660_s15 + $0x58] sm:$0xff] (%p4765_p5), %v3347_v14  ;;  %v3351_v16 = vld [vmem:[%s5452_s23 + $0x68] sm:$0xff] (%p4765_p5)  ;;  %3350 = vst [vmem:[%s5660_s15 + $0x60] sm:$0xff] (%p4765_p5), %v3349_v15 }
 0x308   : > { %3143 = vst.msk [vmem:[%s5452_s23 + $0x178] sm:$0xff] %vm3095_vm4, %v3078_v17  ;;  %v3353_v17 = vld [vmem:[%s5452_s23 + $0x70] sm:$0xff] (%p4765_p5)  ;;  %3352 = vst [vmem:[%s5660_s15 + $0x68] sm:$0xff] (%p4765_p5), %v3351_v16 }
 0x309   : > { %3142 = vst.msk [vmem:[%s5452_s23 + $0x170] sm:$0xff] %vm3095_vm4, %v3077_v18  ;;  %3354 = vst [vmem:[%s5660_s15 + $0x70] sm:$0xff] (%p4765_p5), %v3353_v17  ;;  %v3355_v18 = vld [vmem:[%s5452_s23 + $0x78] sm:$0xff] (%p4765_p5) }
 0x30a   : > { %3356 = vst [vmem:[%s5660_s15 + $0x78] sm:$0xff] (%p4765_p5), %v3355_v18 }
 0x347   : > { %v4403_v19 = vpop.f32.mrb[82].mxu1 }
 0x348   : > { %v2958_v20 = vadd.f32 %v4403_v19, %v5448_v1  ;;  %v2952_v21 = vpop.f32.mrb[83].mxu1  ;;  %v3357_v19 = vld [vmem:[%s5452_s23 + $0x80] sm:$0xff] (%p4765_p5) }
 0x349   : > { %v2953_v22 = vadd.f32 %v5448_v1, %v2952_v21  ;;  %3358 = vst [vmem:[%s5660_s15 + $0x100] sm:$0xff] (%p4765_p5), %v3357_v19  ;;  %v3361_v21 = vld [vmem:[%s5452_s23 + $0x90] sm:$0xff] (%p4765_p5) }
 0x34a   : > { %v3080_v23 = vmax.f32 %v2958_v20, 0.0  ;;  %v3359_v20 = vld [vmem:[%s5452_s23 + $0x88] sm:$0xff] (%p4765_p5)  ;;  %3362 = vst [vmem:[%s5660_s15 + $0x110] sm:$0xff] (%p4765_p5), %v3361_v21 }
 0x34b   : > { %v3079_v24 = vmax.f32 %v2953_v22, 0.0  ;;  %v4406_v25 = vpop.f32.mrb[84].mxu1  ;;  %3360 = vst [vmem:[%s5660_s15 + $0x108] sm:$0xff] (%p4765_p5), %v3359_v20  ;;  %v3363_v22 = vld [vmem:[%s5452_s23 + $0x98] sm:$0xff] (%p4765_p5) }
 0x34c   : > { %3145 = vst.msk [vmem:[%s5452_s23 + $0x188] sm:$0xff] %vm3095_vm4, %v3080_v23  ;;  %v2968_v26 = vadd.f32 %v4406_v25, %v5448_v1  ;;  %v2962_v27 = vpop.f32.mrb[85].mxu1  ;;  %v3365_v23 = vld [vmem:[%s5452_s23 + $0xa0] sm:$0xff] (%p4765_p5)  ;;  %3364 = vst [vmem:[%s5660_s15 + $0x118] sm:$0xff] (%p4765_p5), %v3363_v22  ;;  %v3369_v25 = vld [vmem:[%s5452_s23 + $0xb0] sm:$0xff] (%p4765_p5) }
 0x34d   : > { %3144 = vst.msk [vmem:[%s5452_s23 + $0x180] sm:$0xff] %vm3095_vm4, %v3079_v24  ;;  %v2963_v28 = vadd.f32 %v5448_v1, %v2962_v27  ;;  %3366 = vst [vmem:[%s5660_s15 + $0x120] sm:$0xff] (%p4765_p5), %v3365_v23  ;;  %v3367_v24 = vld [vmem:[%s5452_s23 + $0xa8] sm:$0xff] (%p4765_p5)  ;;  %v3373_v27 = vld [vmem:[%s5452_s23 + $0xc0] sm:$0xff] (%p4765_p5) }
 0x34e   : > { %v3082_v29 = vmax.f32 %v2968_v26, 0.0  ;;  %v3371_v26 = vld [vmem:[%s5452_s23 + $0xb8] sm:$0xff] (%p4765_p5)  ;;  %3368 = vst [vmem:[%s5660_s15 + $0x128] sm:$0xff] (%p4765_p5), %v3367_v24  ;;  %3370 = vst [vmem:[%s5660_s15 + $0x130] sm:$0xff] (%p4765_p5), %v3369_v25 }
 0x34f   : > { %v3081_v32 = vmax.f32 %v2963_v28, 0.0  ;;  %v4409_v33 = vpop.f32.mrb[86].mxu1  ;;  %3372 = vst [vmem:[%s5660_s15 + $0x138] sm:$0xff] (%p4765_p5), %v3371_v26  ;;  %v3375_v28 = vld [vmem:[%s5452_s23 + $0xc8] sm:$0xff] (%p4765_p5)  ;;  %3374 = vst [vmem:[%s5660_s15 + $0x140] sm:$0xff] (%p4765_p5), %v3373_v27 }
 0x350   : > { %3147 = vst.msk [vmem:[%s5452_s23 + $0x198] sm:$0xff] %vm3095_vm4, %v3082_v29  ;;  %v2978_v34 = vadd.f32 %v4409_v33, %v5448_v1  ;;  %v2972_v35 = vpop.f32.mrb[87].mxu1  ;;  %v3377_v29 = vld [vmem:[%s5452_s23 + $0xd0] sm:$0xff] (%p4765_p5)  ;;  %3376 = vst [vmem:[%s5660_s15 + $0x148] sm:$0xff] (%p4765_p5), %v3375_v28  ;;  %v3381_v33 = vld [vmem:[%s5452_s23 + $0xe0] sm:$0xff] (%p4765_p5) }
 0x351   : > { %3146 = vst.msk [vmem:[%s5452_s23 + $0x190] sm:$0xff] %vm3095_vm4, %v3081_v32  ;;  %v2973_v36 = vadd.f32 %v5448_v1, %v2972_v35  ;;  %3378 = vst [vmem:[%s5660_s15 + $0x150] sm:$0xff] (%p4765_p5), %v3377_v29  ;;  %v3379_v32 = vld [vmem:[%s5452_s23 + $0xd8] sm:$0xff] (%p4765_p5)  ;;  %v3385_v35 = vld [vmem:[%s5452_s23 + $0xf0] sm:$0xff] (%p4765_p5) }
 0x352   : > { %v3084_v37 = vmax.f32 %v2978_v34, 0.0  ;;  %v3383_v34 = vld [vmem:[%s5452_s23 + $0xe8] sm:$0xff] (%p4765_p5)  ;;  %3380 = vst [vmem:[%s5660_s15 + $0x158] sm:$0xff] (%p4765_p5), %v3379_v32  ;;  %3382 = vst [vmem:[%s5660_s15 + $0x160] sm:$0xff] (%p4765_p5), %v3381_v33 }
 0x353   : > { %v3083_v38 = vmax.f32 %v2973_v36, 0.0  ;;  %v4412_v39 = vpop.f32.mrb[88].mxu1  ;;  %3384 = vst [vmem:[%s5660_s15 + $0x168] sm:$0xff] (%p4765_p5), %v3383_v34  ;;  %v3387_v36 = vld [vmem:[%s5452_s23 + $0xf8] sm:$0xff] (%p4765_p5)  ;;  %3386 = vst [vmem:[%s5660_s15 + $0x170] sm:$0xff] (%p4765_p5), %v3385_v35 }
 0x354   : > { %3149 = vst.msk [vmem:[%s5452_s23 + $0x1a8] sm:$0xff] %vm3095_vm4, %v3084_v37  ;;  %v2988_v40 = vadd.f32 %v4412_v39, %v5448_v1  ;;  %v2982_v42 = vpop.f32.mrb[89].mxu1  ;;  %v3389_v37 = vld [vmem:[%s5452_s23 + $0x100] sm:$0xff] (%p4765_p5)  ;;  %3388 = vst [vmem:[%s5660_s15 + $0x178] sm:$0xff] (%p4765_p5), %v3387_v36  ;;  %v3393_v39 = vld [vmem:[%s5452_s23 + $0x110] sm:$0xff] (%p4765_p5) }
 0x355   : > { %3148 = vst.msk [vmem:[%s5452_s23 + $0x1a0] sm:$0xff] %vm3095_vm4, %v3083_v38  ;;  %v2983_v44 = vadd.f32 %v5448_v1, %v2982_v42  ;;  %3390 = vst [vmem:[%s5660_s15 + $0x200] sm:$0xff] (%p4765_p5), %v3389_v37  ;;  %v3391_v38 = vld [vmem:[%s5452_s23 + $0x108] sm:$0xff] (%p4765_p5)  ;;  %v3397_v42 = vld [vmem:[%s5452_s23 + $0x120] sm:$0xff] (%p4765_p5) }
 0x356   : > { %v3086_v48 = vmax.f32 %v2988_v40, 0.0  ;;  %v3395_v40 = vld [vmem:[%s5452_s23 + $0x118] sm:$0xff] (%p4765_p5)  ;;  %3392 = vst [vmem:[%s5660_s15 + $0x208] sm:$0xff] (%p4765_p5), %v3391_v38  ;;  %3394 = vst [vmem:[%s5660_s15 + $0x210] sm:$0xff] (%p4765_p5), %v3393_v39 }
 0x357   : > { %v3085_v49 = vmax.f32 %v2983_v44, 0.0  ;;  %v4415_v50 = vpop.f32.mrb[90].mxu1  ;;  %3396 = vst [vmem:[%s5660_s15 + $0x218] sm:$0xff] (%p4765_p5), %v3395_v40  ;;  %v3399_v44 = vld [vmem:[%s5452_s23 + $0x128] sm:$0xff] (%p4765_p5)  ;;  %3398 = vst [vmem:[%s5660_s15 + $0x220] sm:$0xff] (%p4765_p5), %v3397_v42 }
 0x358   : > { %3151 = vst.msk [vmem:[%s5452_s23 + $0x1b8] sm:$0xff] %vm3095_vm4, %v3086_v48  ;;  %v2998_v52 = vadd.f32 %v4415_v50, %v5448_v1  ;;  %v2992_v54 = vpop.f32.mrb[91].mxu1  ;;  %v3401_v48 = vld [vmem:[%s5452_s23 + $0x130] sm:$0xff] (%p4765_p5)  ;;  %3400 = vst [vmem:[%s5660_s15 + $0x228] sm:$0xff] (%p4765_p5), %v3399_v44  ;;  %v3405_v50 = vld [vmem:[%s5452_s23 + $0x140] sm:$0xff] (%p4765_p5) }
 0x359   : > { %3150 = vst.msk [vmem:[%s5452_s23 + $0x1b0] sm:$0xff] %vm3095_vm4, %v3085_v49  ;;  %v2993_v55 = vadd.f32 %v5448_v1, %v2992_v54  ;;  %3402 = vst [vmem:[%s5660_s15 + $0x230] sm:$0xff] (%p4765_p5), %v3401_v48  ;;  %v3403_v49 = vld [vmem:[%s5452_s23 + $0x138] sm:$0xff] (%p4765_p5)  ;;  %v3409_v54 = vld [vmem:[%s5452_s23 + $0x150] sm:$0xff] (%p4765_p5) }
 0x35a   : > { %v3088_v56 = vmax.f32 %v2998_v52, 0.0  ;;  %v3407_v52 = vld [vmem:[%s5452_s23 + $0x148] sm:$0xff] (%p4765_p5)  ;;  %3404 = vst [vmem:[%s5660_s15 + $0x238] sm:$0xff] (%p4765_p5), %v3403_v49  ;;  %3406 = vst [vmem:[%s5660_s15 + $0x240] sm:$0xff] (%p4765_p5), %v3405_v50 }
 0x35b   : > { %v3087_v58 = vmax.f32 %v2993_v55, 0.0  ;;  %v4418_v60 = vpop.f32.mrb[92].mxu1  ;;  %3408 = vst [vmem:[%s5660_s15 + $0x248] sm:$0xff] (%p4765_p5), %v3407_v52  ;;  %v3411_v55 = vld [vmem:[%s5452_s23 + $0x158] sm:$0xff] (%p4765_p5)  ;;  %3410 = vst [vmem:[%s5660_s15 + $0x250] sm:$0xff] (%p4765_p5), %v3409_v54 }
 0x35c   : > { %3153 = vst.msk [vmem:[%s5452_s23 + $0x1c8] sm:$0xff] %vm3095_vm4, %v3088_v56  ;;  %v3008_v30 = vadd.f32 %v4418_v60, %v5448_v1  ;;  %v3002_v31 = vpop.f32.mrb[93].mxu1  ;;  %v3413_v56 = vld [vmem:[%s5452_s23 + $0x160] sm:$0xff] (%p4765_p5)  ;;  %3412 = vst [vmem:[%s5660_s15 + $0x258] sm:$0xff] (%p4765_p5), %v3411_v55  ;;  %v3417_v60 = vld [vmem:[%s5452_s23 + $0x170] sm:$0xff] (%p4765_p5) }
 0x35d   : > { %3152 = vst.msk [vmem:[%s5452_s23 + $0x1c0] sm:$0xff] %vm3095_vm4, %v3087_v58  ;;  %v3003_v61 = vadd.f32 %v5448_v1, %v3002_v31  ;;  %3414 = vst [vmem:[%s5660_s15 + $0x260] sm:$0xff] (%p4765_p5), %v3413_v56  ;;  %v3415_v58 = vld [vmem:[%s5452_s23 + $0x168] sm:$0xff] (%p4765_p5)  ;;  %v3421_v31 = vld [vmem:[%s5452_s23 + $0x180] sm:$0xff] (%p4765_p5) }
 0x35e   : > { %v3090_v62 = vmax.f32 %v3008_v30, 0.0  ;;  %v3419_v30 = vld [vmem:[%s5452_s23 + $0x178] sm:$0xff] (%p4765_p5)  ;;  %3416 = vst [vmem:[%s5660_s15 + $0x268] sm:$0xff] (%p4765_p5), %v3415_v58  ;;  %3418 = vst [vmem:[%s5660_s15 + $0x270] sm:$0xff] (%p4765_p5), %v3417_v60 }
 0x35f   : > { %v3089_v0 = vmax.f32 %v3003_v61, 0.0  ;;  %v4421_v41 = vpop.f32.mrb[94].mxu1  ;;  %3420 = vst [vmem:[%s5660_s15 + $0x278] sm:$0xff] (%p4765_p5), %v3419_v30  ;;  %v3423_v61 = vld [vmem:[%s5452_s23 + $0x188] sm:$0xff] (%p4765_p5)  ;;  %3422 = vst [vmem:[%s5660_s15 + $0x300] sm:$0xff] (%p4765_p5), %v3421_v31 }
 0x360   : > { %3155 = vst.msk [vmem:[%s5452_s23 + $0x1d8] sm:$0xff] %vm3095_vm4, %v3090_v62  ;;  %v3018_v46 = vadd.f32 %v4421_v41, %v5448_v1  ;;  %v3012_v43 = vpop.f32.mrb[95].mxu1  ;;  %v3425_v62 = vld [vmem:[%s5452_s23 + $0x190] sm:$0xff] (%p4765_p5)  ;;  %3424 = vst [vmem:[%s5660_s15 + $0x308] sm:$0xff] (%p4765_p5), %v3423_v61  ;;  %v3429_v41 = vld [vmem:[%s5452_s23 + $0x1a0] sm:$0xff] (%p4765_p5) }
 0x361   : > { %3154 = vst.msk [vmem:[%s5452_s23 + $0x1d0] sm:$0xff] %vm3095_vm4, %v3089_v0  ;;  %v3013_v45 = vadd.f32 %v5448_v1, %v3012_v43  ;;  %3426 = vst [vmem:[%s5660_s15 + $0x310] sm:$0xff] (%p4765_p5), %v3425_v62  ;;  %v3427_v0 = vld [vmem:[%s5452_s23 + $0x198] sm:$0xff] (%p4765_p5)  ;;  %v3433_v43 = vld [vmem:[%s5452_s23 + $0x1b0] sm:$0xff] (%p4765_p5) }
 0x362   : > { %v3092_v47 = vmax.f32 %v3018_v46, 0.0  ;;  %v3431_v46 = vld [vmem:[%s5452_s23 + $0x1a8] sm:$0xff] (%p4765_p5)  ;;  %3428 = vst [vmem:[%s5660_s15 + $0x318] sm:$0xff] (%p4765_p5), %v3427_v0  ;;  %3430 = vst [vmem:[%s5660_s15 + $0x320] sm:$0xff] (%p4765_p5), %v3429_v41 }
 0x363   : > { %v3091_v51 = vmax.f32 %v3013_v45, 0.0  ;;  %v4424_v57 = vpop.f32.mrb[96].mxu1  ;;  %3166 = sbr.rel (!%p4765_p5) target bundleno = 882 (0x372), region = 56  ;;  %3432 = vst [vmem:[%s5660_s15 + $0x328] sm:$0xff] (%p4765_p5), %v3431_v46  ;;  %v3435_v45 = vld [vmem:[%s5452_s23 + $0x1b8] sm:$0xff] (%p4765_p5)  ;;  %3434 = vst [vmem:[%s5660_s15 + $0x330] sm:$0xff] (%p4765_p5), %v3433_v43 }
 0x364   : > { %3157 = vst.msk [vmem:[%s5452_s23 + $0x1e8] sm:$0xff] %vm3095_vm4, %v3092_v47  ;;  %v3028_v59 = vadd.f32 %v4424_v57, %v5448_v1  ;;  %v3022_v63 = vpop.f32.mrb[97].mxu1  ;;  %v3437_v47 = vld [vmem:[%s5452_s23 + $0x1c0] sm:$0xff] (%p4765_p5)  ;;  %3436 = vst [vmem:[%s5660_s15 + $0x338] sm:$0xff] (%p4765_p5), %v3435_v45 }
 0x365   : > { %3156 = vst.msk [vmem:[%s5452_s23 + $0x1e0] sm:$0xff] %vm3095_vm4, %v3091_v51  ;;  %v3023_v2 = vadd.f32 %v5448_v1, %v3022_v63  ;;  %v3325_v1 = vld [vmem:[%s5452_s23] sm:$0xff] (%p4765_p5)  ;;  %3438 = vst [vmem:[%s5660_s15 + $0x340] sm:$0xff] (%p4765_p5), %v3437_v47  ;;  %v3439_v51 = vld [vmem:[%s5452_s23 + $0x1c8] sm:$0xff] (%p4765_p5) }
 0x366   : > { %v3094_v53 = vmax.f32 %v3028_v59, 0.0  ;;  %3326 = vst [vmem:[%s5660_s15] sm:$0xff] (%p4765_p5), %v3325_v1  ;;  %3440 = vst [vmem:[%s5660_s15 + $0x348] sm:$0xff] (%p4765_p5), %v3439_v51 }
 0x367   : > { %v3093_v3 = vmax.f32 %v3023_v2, 0.0  ;;  %v3443_v59 = vld [vmem:[%s5452_s23 + $0x1d8] sm:$0xff] (%p4765_p5) }
 0x368   : > { %3159 = vst.msk [vmem:[%s5452_s23 + $0x1f8] sm:$0xff] %vm3095_vm4, %v3094_v53  ;;  %v3441_v57 = vld [vmem:[%s5452_s23 + $0x1d0] sm:$0xff] (%p4765_p5)  ;;  %3444 = vst [vmem:[%s5660_s15 + $0x358] sm:$0xff] (%p4765_p5), %v3443_v59 }
 0x369   : > { %3158 = vst.msk [vmem:[%s5452_s23 + $0x1f0] sm:$0xff] %vm3095_vm4, %v3093_v3  ;;  %3442 = vst [vmem:[%s5660_s15 + $0x350] sm:$0xff] (%p4765_p5), %v3441_v57 }
 0x36b   : > { %v3447_v2 = vld [vmem:[%s5452_s23 + $0x1e8] sm:$0xff] }
 0x36c   : > { %v3445_v63 = vld [vmem:[%s5452_s23 + $0x1e0] sm:$0xff]  ;;  %3448 = vst [vmem:[%s5660_s15 + $0x368] sm:$0xff] %v3447_v2 }
 0x36d   : > { %3446 = vst [vmem:[%s5660_s15 + $0x360] sm:$0xff] %v3445_v63 }
 0x36f   : > { %v3451_v3 = vld [vmem:[%s5452_s23 + $0x1f8] sm:$0xff] }
 0x370   : > { %v3449_v53 = vld [vmem:[%s5452_s23 + $0x1f0] sm:$0xff]  ;;  %3452 = vst [vmem:[%s5660_s15 + $0x378] sm:$0xff] %v3451_v3 }
 0x371   : > { %3450 = vst [vmem:[%s5660_s15 + $0x370] sm:$0xff] %v3449_v53 }
 0x372 PF: > { %s18_s11 = sadd.s32 1, %s4672_s11   ;;  %s5814_s27 = smov %s4652_s28 }
 0x373   : > { %p15_p13 = scmp.ge.s32.totalorder %s18_s11, 6   ;;  %s5815_s28 = smov %s4776_s20 }
 0x374   : > { %s5816_s29 = smov %s4664_s9  ;;  %s5817_s30 = smov %s4668_s10 }
 0x375   : > { %s5818_s9 = smov %s5821_s12  ;;  %s5819_s10 = smov %s5825_s13 }
 0x376   :  { %17 = sbr.rel (!%p15_p13) target bundleno = 6 (0x6), region = 131 }

</bundles_post_ra>
